<compile_context>
chip_gen: v7x
topology: tpu7x:2x2x1
jax: 0.10.0
libtpu: 0.0.40
codegen_flags: <defaults>
</compile_context>

<pallas_src>
import math

import jax
import jax.numpy as jnp
import numpy as np
from jax import lax
from jax.experimental import pallas as pl
from jax.experimental.pallas import tpu as pltpu

# Small, module-consistent shapes.
B, S, D = 2, 8, 32           # batch, seq, dModel
NH = 4                        # heads
DK = D // NH                  # head dim
HID = 64                      # FFN hidden size
EPS = 1e-5                    # nn.LayerNorm default eps
SCALE = 1.0 / math.sqrt(DK)
NEG_BIAS = -1e9               # additive mask bias
BS = B * S
HIGHEST = lax.Precision.HIGHEST


def decoder_block_kernel(enc_ref, bias_ref,
                         wqkv_ref, bqkv_ref,
                         wo_ref, bo_ref,
                         w1_ref, b1_ref, w2_ref, b2_ref,
                         lnw_ref, lnb_ref,
                         out_ref):
    x = enc_ref[...]                          # [BS, D] f32 (xself == encOut, eval mode)
    bias = bias_ref[...]                      # [BS, BS] additive mask bias (0 / -1e9)

    # Fused QKV projection (1/sqrt(DK) already folded into the Q columns & bias).
    qkv = jnp.dot(x, wqkv_ref[...], precision=HIGHEST,
                  preferred_element_type=jnp.float32) + bqkv_ref[...]   # [BS, 3D]
    q = qkv[:, 0 * D:1 * D]
    k = qkv[:, 1 * D:2 * D]
    v = qkv[:, 2 * D:3 * D]

    # Head-batched attention: [NH, BS, DK].
    qh = q.reshape(BS, NH, DK).transpose(1, 0, 2)
    kh = k.reshape(BS, NH, DK).transpose(1, 0, 2)
    vh = v.reshape(BS, NH, DK).transpose(1, 0, 2)

    s = jnp.einsum('hqd,hkd->hqk', qh, kh, precision=HIGHEST,
                   preferred_element_type=jnp.float32)                  # [NH, BS, BS]
    s = s + bias[None, :, :]
    s = s - jnp.max(s, axis=-1, keepdims=True)
    e = jnp.exp(s)
    p = e / jnp.sum(e, axis=-1, keepdims=True)                          # exact softmax
    attn = jnp.einsum('hqk,hkd->hqd', p, vh, precision=HIGHEST,
                      preferred_element_type=jnp.float32)               # [NH, BS, DK]
    attn = attn.transpose(1, 0, 2).reshape(BS, D)

    o = jnp.dot(attn, wo_ref[...], precision=HIGHEST,
                preferred_element_type=jnp.float32) + bo_ref[...]
    x1 = x + o                                                          # residual[1]

    # residual[2]: x1 + FFN(LayerNorm(x1)) -- the `Residual` pattern proper.
    mean = jnp.mean(x1, axis=-1, keepdims=True)
    var = jnp.mean((x1 - mean) ** 2, axis=-1, keepdims=True)            # biased variance
    ln = (x1 - mean) * lax.rsqrt(var + EPS) * lnw_ref[...] + lnb_ref[...]

    h1 = jnp.dot(ln, w1_ref[...], precision=HIGHEST,
                 preferred_element_type=jnp.float32) + b1_ref[...]
    h1 = h1 * jnp.tanh(jnp.logaddexp(h1, 0.0))                          # Mish
    y = jnp.dot(h1, w2_ref[...], precision=HIGHEST,
                preferred_element_type=jnp.float32) + b2_ref[...]

    out_ref[...] = (x1 + y).astype(out_ref.dtype)


def prep_params(p):
    """One-time (init-time) weight preprocessing: transpose to [in, out], fuse QKV,
    fold the attention scale into the Q columns. Nothing here runs per call."""
    wqkv = jnp.concatenate([p["wq"].T * SCALE, p["wk"].T, p["wv"].T], axis=1)  # [D, 3D]
    bqkv = jnp.concatenate([p["bq"] * SCALE, p["bk"], p["bv"]], axis=1)        # [1, 3D]
    return {
        "wqkv": wqkv, "bqkv": bqkv,
        "wo": p["wo"].T, "bo": p["bo"],
        "w1": p["w1"].T, "b1": p["b1"],
        "w2": p["w2"].T, "b2": p["b2"],
        "lnw": p["ln2_w"], "lnb": p["ln2_b"],
    }


@jax.jit
def decoder_block_cstm(x, enc_out, pad_mask_t, cau_mask_t, prepped):
    """Eval-mode forward. Returns (x_out, xself).

    `x` and `pad_mask_t` only affect the training-mode / discarded self-attention
    branch; they are accepted for signature fidelity (x non-None => crossMask = ~cauMaskT).
    """
    del x, pad_mask_t  # dead in the eval-mode output path
    b, s, d = enc_out.shape
    bs = b * s

    # Additive attention bias, block-diagonal across the flattened batch.  Built
    # inside jit => fused XLA ops, no eager per-call dispatch overhead.
    batch_id = jnp.arange(bs) // s
    same_batch = batch_id[:, None] == batch_id[None, :]
    allow = same_batch & jnp.tile(~cau_mask_t, (b, b))          # True = attend
    bias = jnp.where(allow, 0.0, NEG_BIAS).astype(jnp.float32)

    args = (
        enc_out.reshape(bs, d).astype(jnp.float32), bias,
        prepped["wqkv"], prepped["bqkv"],
        prepped["wo"], prepped["bo"],
        prepped["w1"], prepped["b1"],
        prepped["w2"], prepped["b2"],
        prepped["lnw"], prepped["lnb"],
    )

    vmem_spec = pl.BlockSpec(memory_space=pltpu.MemorySpace.VMEM)
    x_out = pl.pallas_call(
        decoder_block_kernel,
        out_shape=jax.ShapeDtypeStruct((bs, d), jnp.float32),
        in_specs=[vmem_spec] * len(args),
        out_specs=vmem_spec,
    )(*args)
    return x_out.reshape(b, s, d), enc_out


def init_params(key):
    """Deterministic params matching nn.Linear / nn.LayerNorm shapes & init style."""
    ks = jax.random.split(key, 6)

    def linear(k, out_f, in_f):
        kw, kb = jax.random.split(k)
        bound = 1.0 / math.sqrt(in_f)
        w = jax.random.uniform(kw, (out_f, in_f), jnp.float32, -bound, bound)
        b = jax.random.uniform(kb, (1, out_f), jnp.float32, -bound, bound)
        return w, b

    p = {}
    p["wq"], p["bq"] = linear(ks[0], D, D)
    p["wk"], p["bk"] = linear(ks[1], D, D)
    p["wv"], p["bv"] = linear(ks[2], D, D)
    p["wo"], p["bo"] = linear(ks[3], D, D)
    p["w1"], p["b1"] = linear(ks[4], HID, D)
    p["w2"], p["b2"] = linear(ks[5], D, HID)
    p["ln2_w"] = jnp.ones((1, D), jnp.float32)
    p["ln2_b"] = jnp.zeros((1, D), jnp.float32)
    return p


def reference(enc_out, cau_mask_t, params):
    """Pure-JAX f32 reference of the eval-mode forward (module semantics)."""
    def lin(a, w, bias):                        # a: [..., in], w: [out, in]
        return jnp.einsum('...i,oi->...o', a, w, precision=HIGHEST,
                          preferred_element_type=jnp.float32) + bias

    x = enc_out
    q = lin(x, params["wq"], params["bq"]).reshape(B, S, NH, DK).transpose(0, 2, 1, 3)
    k = lin(x, params["wk"], params["bk"]).reshape(B, S, NH, DK).transpose(0, 2, 1, 3)
    v = lin(x, params["wv"], params["bv"]).reshape(B, S, NH, DK).transpose(0, 2, 1, 3)

    add_bias = jnp.where(~cau_mask_t, 0.0, NEG_BIAS).astype(jnp.float32)      # [S, S]
    scores = jnp.einsum('bhqd,bhkd->bhqk', q, k, precision=HIGHEST,
                        preferred_element_type=jnp.float32) * SCALE + add_bias[None, None]
    p = jax.nn.softmax(scores, axis=-1)
    attn = jnp.einsum('bhqk,bhkd->bhqd', p, v, precision=HIGHEST,
                      preferred_element_type=jnp.float32)
    attn = attn.transpose(0, 2, 1, 3).reshape(B, S, D)
    x1 = x + lin(attn, params["wo"], params["bo"])

    mean = jnp.mean(x1, axis=-1, keepdims=True)
    var = jnp.mean((x1 - mean) ** 2, axis=-1, keepdims=True)
    ln = (x1 - mean) * lax.rsqrt(var + EPS) * params["ln2_w"] + params["ln2_b"]
    h = lin(ln, params["w1"], params["b1"])
    h = h * jnp.tanh(jnp.logaddexp(h, 0.0))
    return x1 + lin(h, params["w2"], params["b2"])


if __name__ == "__main__":
    key = jax.random.PRNGKey(0)
    k_in, k_enc, k_par = jax.random.split(key, 3)

    x_in = jax.random.normal(k_in, (B, S, D), jnp.float32)        # decoder input
    enc_out = jax.random.normal(k_enc, (B, S, D), jnp.float32)    # encoder output
    pad_mask_t = jnp.zeros((B, S), jnp.bool_)                     # no padding
    cau_mask_t = jnp.triu(jnp.ones((S, S), jnp.bool_), k=1)       # True = masked

    params = init_params(k_par)
    prepped = prep_params(params)                                 # one-time weight prep

    x_out, xself = decoder_block_cstm(x_in, enc_out, pad_mask_t, cau_mask_t, prepped)
    x_out = jax.block_until_ready(x_out)

    ref = reference(enc_out, cau_mask_t, params)
    # Both sides are pure f32 with HIGHEST-precision matmuls; residual differences are
    # only accumulation-order / rsqrt-rounding level (~1e-6).
    np.testing.assert_allclose(np.asarray(x_out), np.asarray(ref), rtol=1e-3, atol=1e-3)
    np.testing.assert_allclose(np.asarray(xself), np.asarray(enc_out))

    print("KERNEL_OK")
</pallas_src>

<mosaic_0001>
module attributes {stable_mosaic.version = 11 : i64} {
  func.func @decoder_block_kernel(%arg0: memref<16x32xf32, #tpu.memory_space<vmem>>, %arg1: memref<16x16xf32, #tpu.memory_space<vmem>>, %arg2: memref<32x96xf32, #tpu.memory_space<vmem>>, %arg3: memref<1x96xf32, #tpu.memory_space<vmem>>, %arg4: memref<32x32xf32, #tpu.memory_space<vmem>>, %arg5: memref<1x32xf32, #tpu.memory_space<vmem>>, %arg6: memref<32x64xf32, #tpu.memory_space<vmem>>, %arg7: memref<1x64xf32, #tpu.memory_space<vmem>>, %arg8: memref<64x32xf32, #tpu.memory_space<vmem>>, %arg9: memref<1x32xf32, #tpu.memory_space<vmem>>, %arg10: memref<1x32xf32, #tpu.memory_space<vmem>>, %arg11: memref<1x32xf32, #tpu.memory_space<vmem>>, %arg12: memref<16x32xf32, #tpu.memory_space<vmem>>) attributes {dimension_semantics = [], scalar_prefetch = 0 : i64, scratch_operands = 0 : i64, tpu.core_type = #tpu.core_type<tc>} {
    %c0 = arith.constant 0 : index
    %c0_0 = arith.constant 0 : index
    %0 = vector.load %arg0[%c0, %c0_0] : memref<16x32xf32, #tpu.memory_space<vmem>>, vector<16x32xf32>
    %c0_1 = arith.constant 0 : index
    %c0_2 = arith.constant 0 : index
    %1 = vector.load %arg1[%c0_1, %c0_2] : memref<16x16xf32, #tpu.memory_space<vmem>>, vector<16x16xf32>
    %c0_3 = arith.constant 0 : index
    %c0_4 = arith.constant 0 : index
    %2 = vector.load %arg2[%c0_3, %c0_4] : memref<32x96xf32, #tpu.memory_space<vmem>>, vector<32x96xf32>
    %cst = arith.constant dense<0.000000e+00> : vector<16x96xf32>
    %3 = tpu.matmul %0, %2, %cst {dimension_numbers = #tpu.dot_dimension_numbers<[1], [0], [0], [1], [0, 0, 1, 1], [], []>, precision = #tpu.contract_precision<fp32>} : vector<16x32xf32>, vector<32x96xf32>, vector<16x96xf32> -> vector<16x96xf32>
    %c0_5 = arith.constant 0 : index
    %c0_6 = arith.constant 0 : index
    %4 = vector.load %arg3[%c0_5, %c0_6] : memref<1x96xf32, #tpu.memory_space<vmem>>, vector<1x96xf32>
    %5 = vector.broadcast %4 : vector<1x96xf32> to vector<16x96xf32>
    %6 = arith.addf %3, %5 : vector<16x96xf32>
    %7 = vector.extract_strided_slice %6 {offsets = [0, 0], sizes = [16, 32], strides = [1, 1]} : vector<16x96xf32> to vector<16x32xf32>
    %8 = vector.extract_strided_slice %6 {offsets = [0, 32], sizes = [16, 32], strides = [1, 1]} : vector<16x96xf32> to vector<16x32xf32>
    %9 = vector.extract_strided_slice %6 {offsets = [0, 64], sizes = [16, 32], strides = [1, 1]} : vector<16x96xf32> to vector<16x32xf32>
    %10 = vector.shape_cast %7 : vector<16x32xf32> to vector<16x4x8xf32>
    %11 = tpu.transpose %10, [1, 0, 2] : vector<16x4x8xf32> -> vector<4x16x8xf32>
    %12 = vector.shape_cast %8 : vector<16x32xf32> to vector<16x4x8xf32>
    %13 = tpu.transpose %12, [1, 0, 2] : vector<16x4x8xf32> -> vector<4x16x8xf32>
    %14 = vector.shape_cast %9 : vector<16x32xf32> to vector<16x4x8xf32>
    %15 = tpu.transpose %14, [1, 0, 2] : vector<16x4x8xf32> -> vector<4x16x8xf32>
    "tpu.trace_start"() <{level = 10 : i32, message = "hqd,hkd->hqk"}> : () -> ()
    %cst_7 = arith.constant dense<0.000000e+00> : vector<4x16x16xf32>
    %16 = tpu.matmul %11, %13, %cst_7 {dimension_numbers = #tpu.dot_dimension_numbers<[2], [2], [1], [1], [0, 0, 0, 1, 1, 1], [0], [0]>, precision = #tpu.contract_precision<fp32>} : vector<4x16x8xf32>, vector<4x16x8xf32>, vector<4x16x16xf32> -> vector<4x16x16xf32>
    "tpu.trace_stop"() : () -> ()
    %17 = vector.shape_cast %1 : vector<16x16xf32> to vector<1x16x16xf32>
    %18 = vector.broadcast %17 : vector<1x16x16xf32> to vector<4x16x16xf32>
    %19 = arith.addf %16, %18 : vector<4x16x16xf32>
    %cst_8 = arith.constant dense<0xFF800000> : vector<4x16xf32>
    %20 = vector.multi_reduction <maximumf>, %19, %cst_8 [2] : vector<4x16x16xf32> to vector<4x16xf32>
    %21 = vector.shape_cast %20 : vector<4x16xf32> to vector<4x16x1xf32>
    %22 = vector.broadcast %21 : vector<4x16x1xf32> to vector<4x16x16xf32>
    %23 = arith.subf %19, %22 : vector<4x16x16xf32>
    %24 = math.exp %23 : vector<4x16x16xf32>
    %cst_9 = arith.constant dense<0.000000e+00> : vector<4x16xf32>
    %25 = vector.multi_reduction <add>, %24, %cst_9 [2] : vector<4x16x16xf32> to vector<4x16xf32>
    %26 = vector.shape_cast %25 : vector<4x16xf32> to vector<4x16x1xf32>
    %27 = vector.broadcast %26 : vector<4x16x1xf32> to vector<4x16x16xf32>
    %28 = arith.divf %24, %27 : vector<4x16x16xf32>
    "tpu.trace_start"() <{level = 10 : i32, message = "hqk,hkd->hqd"}> : () -> ()
    %cst_10 = arith.constant dense<0.000000e+00> : vector<4x16x8xf32>
    %29 = tpu.matmul %28, %15, %cst_10 {dimension_numbers = #tpu.dot_dimension_numbers<[2], [1], [1], [2], [0, 0, 0, 1, 1, 2], [0], [0]>, precision = #tpu.contract_precision<fp32>} : vector<4x16x16xf32>, vector<4x16x8xf32>, vector<4x16x8xf32> -> vector<4x16x8xf32>
    "tpu.trace_stop"() : () -> ()
    %30 = tpu.transpose %29, [1, 0, 2] : vector<4x16x8xf32> -> vector<16x4x8xf32>
    %31 = vector.shape_cast %30 : vector<16x4x8xf32> to vector<16x32xf32>
    %c0_11 = arith.constant 0 : index
    %c0_12 = arith.constant 0 : index
    %32 = vector.load %arg4[%c0_11, %c0_12] : memref<32x32xf32, #tpu.memory_space<vmem>>, vector<32x32xf32>
    %cst_13 = arith.constant dense<0.000000e+00> : vector<16x32xf32>
    %33 = tpu.matmul %31, %32, %cst_13 {dimension_numbers = #tpu.dot_dimension_numbers<[1], [0], [0], [1], [0, 0, 1, 1], [], []>, precision = #tpu.contract_precision<fp32>} : vector<16x32xf32>, vector<32x32xf32>, vector<16x32xf32> -> vector<16x32xf32>
    %c0_14 = arith.constant 0 : index
    %c0_15 = arith.constant 0 : index
    %34 = vector.load %arg5[%c0_14, %c0_15] : memref<1x32xf32, #tpu.memory_space<vmem>>, vector<1x32xf32>
    %35 = vector.broadcast %34 : vector<1x32xf32> to vector<16x32xf32>
    %36 = arith.addf %33, %35 : vector<16x32xf32>
    %37 = arith.addf %0, %36 : vector<16x32xf32>
    %cst_16 = arith.constant dense<0.000000e+00> : vector<16xf32>
    %38 = vector.multi_reduction <add>, %37, %cst_16 [1] : vector<16x32xf32> to vector<16xf32>
    %39 = vector.shape_cast %38 : vector<16xf32> to vector<16x1xf32>
    %cst_17 = arith.constant 3.200000e+01 : f32
    %40 = vector.broadcast %cst_17 : f32 to vector<16x1xf32>
    %41 = arith.divf %39, %40 : vector<16x1xf32>
    %42 = vector.broadcast %41 : vector<16x1xf32> to vector<16x32xf32>
    %43 = arith.subf %37, %42 : vector<16x32xf32>
    %44 = arith.mulf %43, %43 : vector<16x32xf32>
    %cst_18 = arith.constant dense<0.000000e+00> : vector<16xf32>
    %45 = vector.multi_reduction <add>, %44, %cst_18 [1] : vector<16x32xf32> to vector<16xf32>
    %46 = vector.shape_cast %45 : vector<16xf32> to vector<16x1xf32>
    %cst_19 = arith.constant 3.200000e+01 : f32
    %47 = vector.broadcast %cst_19 : f32 to vector<16x1xf32>
    %48 = arith.divf %46, %47 : vector<16x1xf32>
    %49 = vector.broadcast %41 : vector<16x1xf32> to vector<16x32xf32>
    %50 = arith.subf %37, %49 : vector<16x32xf32>
    %cst_20 = arith.constant 9.99999974E-6 : f32
    %51 = vector.broadcast %cst_20 : f32 to vector<16x1xf32>
    %52 = arith.addf %48, %51 : vector<16x1xf32>
    %53 = math.rsqrt %52 : vector<16x1xf32>
    %54 = vector.broadcast %53 : vector<16x1xf32> to vector<16x32xf32>
    %55 = arith.mulf %50, %54 : vector<16x32xf32>
    %c0_21 = arith.constant 0 : index
    %c0_22 = arith.constant 0 : index
    %56 = vector.load %arg10[%c0_21, %c0_22] : memref<1x32xf32, #tpu.memory_space<vmem>>, vector<1x32xf32>
    %57 = vector.broadcast %56 : vector<1x32xf32> to vector<16x32xf32>
    %58 = arith.mulf %55, %57 : vector<16x32xf32>
    %c0_23 = arith.constant 0 : index
    %c0_24 = arith.constant 0 : index
    %59 = vector.load %arg11[%c0_23, %c0_24] : memref<1x32xf32, #tpu.memory_space<vmem>>, vector<1x32xf32>
    %60 = vector.broadcast %59 : vector<1x32xf32> to vector<16x32xf32>
    %61 = arith.addf %58, %60 : vector<16x32xf32>
    %c0_25 = arith.constant 0 : index
    %c0_26 = arith.constant 0 : index
    %62 = vector.load %arg6[%c0_25, %c0_26] : memref<32x64xf32, #tpu.memory_space<vmem>>, vector<32x64xf32>
    %cst_27 = arith.constant dense<0.000000e+00> : vector<16x64xf32>
    %63 = tpu.matmul %61, %62, %cst_27 {dimension_numbers = #tpu.dot_dimension_numbers<[1], [0], [0], [1], [0, 0, 1, 1], [], []>, precision = #tpu.contract_precision<fp32>} : vector<16x32xf32>, vector<32x64xf32>, vector<16x64xf32> -> vector<16x64xf32>
    %c0_28 = arith.constant 0 : index
    %c0_29 = arith.constant 0 : index
    %64 = vector.load %arg7[%c0_28, %c0_29] : memref<1x64xf32, #tpu.memory_space<vmem>>, vector<1x64xf32>
    %65 = vector.broadcast %64 : vector<1x64xf32> to vector<16x64xf32>
    %66 = arith.addf %63, %65 : vector<16x64xf32>
    %cst_30 = arith.constant 0.000000e+00 : f32
    %67 = vector.broadcast %cst_30 : f32 to vector<16x64xf32>
    %68 = arith.maximumf %66, %67 : vector<16x64xf32>
    %69 = vector.broadcast %cst_30 : f32 to vector<16x64xf32>
    %70 = arith.subf %66, %69 : vector<16x64xf32>
    %71 = arith.cmpf one, %70, %70 : vector<16x64xf32>
    %72 = vector.broadcast %cst_30 : f32 to vector<16x64xf32>
    %73 = arith.addf %66, %72 : vector<16x64xf32>
    %74 = math.absf %70 : vector<16x64xf32>
    %cst_31 = arith.constant 0.000000e+00 : f32
    %75 = vector.broadcast %cst_31 : f32 to vector<16x64xf32>
    %76 = arith.subf %75, %74 : vector<16x64xf32>
    %77 = math.exp %76 : vector<16x64xf32>
    %78 = math.log1p %77 : vector<16x64xf32>
    %79 = arith.addf %68, %78 : vector<16x64xf32>
    %80 = arith.select %71, %73, %79 : vector<16x64xi1>, vector<16x64xf32>
    %81 = math.tanh %80 : vector<16x64xf32>
    %82 = arith.mulf %66, %81 : vector<16x64xf32>
    %c0_32 = arith.constant 0 : index
    %c0_33 = arith.constant 0 : index
    %83 = vector.load %arg8[%c0_32, %c0_33] : memref<64x32xf32, #tpu.memory_space<vmem>>, vector<64x32xf32>
    %cst_34 = arith.constant dense<0.000000e+00> : vector<16x32xf32>
    %84 = tpu.matmul %82, %83, %cst_34 {dimension_numbers = #tpu.dot_dimension_numbers<[1], [0], [0], [1], [0, 0, 1, 1], [], []>, precision = #tpu.contract_precision<fp32>} : vector<16x64xf32>, vector<64x32xf32>, vector<16x32xf32> -> vector<16x32xf32>
    %c0_35 = arith.constant 0 : index
    %c0_36 = arith.constant 0 : index
    %85 = vector.load %arg9[%c0_35, %c0_36] : memref<1x32xf32, #tpu.memory_space<vmem>>, vector<1x32xf32>
    %86 = vector.broadcast %85 : vector<1x32xf32> to vector<16x32xf32>
    %87 = arith.addf %84, %86 : vector<16x32xf32>
    %88 = arith.addf %37, %87 : vector<16x32xf32>
    %c0_37 = arith.constant 0 : index
    %c0_38 = arith.constant 0 : index
    %89 = vector.load %arg12[%c0_37, %c0_38] : memref<16x32xf32, #tpu.memory_space<vmem>>, vector<16x32xf32>
    tpu.vector_store %arg12[%c0_37, %c0_38], %88 {strides = array<i32>} : memref<16x32xf32, #tpu.memory_space<vmem>>, vector<16x32xf32>,
    return
  }
}

</mosaic_0001>

<bundles_post_ra>
// kernel: tile.8
= control target key start
LH: loop header
LB: loop body
LE: loop exit
PB: predicated region body
PF: predicated region fallthrough
CT: control target
= control target key end

     0   :  { %v141_v10 = vmov 0   ;;  %s206_s0 = inlined_call_operand.vmem [shape: pred[8,8], index: 0, kind: input, shape index: {}]   ;;  %s207_s1 = inlined_call_operand.vmem [shape: pred[2,8,2,8], index: 1, kind: output, shape index: {}]  }
   0x1   :  { %v4_v0 = vld [vmem:[%s206_s0] ss:$0 sm:$0xff]  ;;  %v127_v1 = vld [vmem:[%s206_s0 + $0x1] ss:$0 sm:$0xff] }
   0x2   :  { %v7_v2 = vand.u32 255, %v4_v0  ;;  %v19_v3 = vshra.s32 %v4_v0, 8  ;;  %v33_v4 = vshra.s32 %v4_v0, 16  ;;  %v124_v5 = vshrl.u32 %v4_v0, 24 }
   0x3   :  { %v63_v6 = vand.u32 255, %v127_v1  ;;  %v77_v7 = vshra.s32 %v127_v1, 8  ;;  %v92_v8 = vshra.s32 %v127_v1, 16  ;;  %v137_v9 = vshrl.u32 %v127_v1, 24 }
   0x4   :  { %v8_v11 = vpack.c.b16 %v141_v10, %v7_v2  ;;  %v20_v12 = vand.u32 255, %v19_v3  ;;  %v34_v13 = vand.u32 255, %v33_v4  ;;  %v50_v14 = vpack.c.b16 %v141_v10, %v124_v5 }
   0x5   :  { %v65_v15 = vpack.c.b16 %v141_v10, %v63_v6  ;;  %v78_v16 = vand.u32 255, %v77_v7  ;;  %v93_v17 = vand.u32 255, %v92_v8  ;;  %v110_v18 = vpack.c.b16 %v141_v10, %v137_v9 }
   0x6   :  { %v9_v19 = vpack.c.b8 %v141_v10, %v8_v11  ;;  %v22_v20 = vpack.c.b16 %v141_v10, %v20_v12  ;;  %v36_v21 = vpack.c.b16 %v141_v10, %v34_v13  ;;  %v51_v22 = vpack.c.b8 %v141_v10, %v50_v14 }
   0x7   :  { %v66_v23 = vpack.c.b8 %v141_v10, %v65_v15  ;;  %v80_v24 = vpack.c.b16 %v141_v10, %v78_v16  ;;  %v95_v25 = vpack.c.b16 %v141_v10, %v93_v17  ;;  %v111_v26 = vpack.c.b8 %v141_v10, %v110_v18 }
   0x8   :  { %11 = vst [vmem:[%s207_s1] sm:$0x1] %v9_v19  ;;  %119 = vst [vmem:[%s207_s1 + $0x8] sm:$0x1] %v9_v19  ;;  %v23_v27 = vpack.c.b8 %v141_v10, %v22_v20  ;;  %v37_v28 = vpack.c.b8 %v141_v10, %v36_v21 }
   0x9   :  { %125 = vst [vmem:[%s207_s1 + $0x3] sm:$0x1] %v51_v22  ;;  %126 = vst [vmem:[%s207_s1 + $0xb] sm:$0x1] %v51_v22  ;;  %v81_v29 = vpack.c.b8 %v141_v10, %v80_v24  ;;  %v96_v30 = vpack.c.b8 %v141_v10, %v95_v25 }
   0xa   :  { %128 = vst [vmem:[%s207_s1 + $0x4] sm:$0x1] %v66_v23  ;;  %129 = vst [vmem:[%s207_s1 + $0xc] sm:$0x1] %v66_v23 }
   0xb   :  { %138 = vst [vmem:[%s207_s1 + $0x7] sm:$0x1] %v111_v26  ;;  %139 = vst [vmem:[%s207_s1 + $0xf] sm:$0x1] %v111_v26 }
   0xc   :  { %120 = vst [vmem:[%s207_s1 + $0x1] sm:$0x1] %v23_v27  ;;  %121 = vst [vmem:[%s207_s1 + $0x9] sm:$0x1] %v23_v27 }
   0xd   :  { %122 = vst [vmem:[%s207_s1 + $0x2] sm:$0x1] %v37_v28  ;;  %123 = vst [vmem:[%s207_s1 + $0xa] sm:$0x1] %v37_v28 }
   0xe   :  { %131 = vst [vmem:[%s207_s1 + $0x5] sm:$0x1] %v81_v29  ;;  %132 = vst [vmem:[%s207_s1 + $0xd] sm:$0x1] %v81_v29 }
   0xf   :  { %134 = vst [vmem:[%s207_s1 + $0x6] sm:$0x1] %v96_v30  ;;  %135 = vst [vmem:[%s207_s1 + $0xe] sm:$0x1] %v96_v30 }

// kernel: tile.9
= control target key start
LH: loop header
LB: loop body
LE: loop exit
PB: predicated region body
PF: predicated region fallthrough
CT: control target
= control target key end

     0   :  { %vm259_vm0 = vcmask 1047556   ;;  %vm261_vm1 = vcmask 64512   ;;  %vm280_vm2 = vcmask 130112   ;;  %v342_v47 = vmov 0   ;;  %s413_s0 = inlined_call_operand.vmem [shape: pred[2,8,2,8], index: 0, kind: input, shape index: {}]   ;;  %s414_s1 = inlined_call_operand.vmem [shape: pred[16,16], index: 1, kind: output, shape index: {}]  }
   0x1   :  { %v331_v0 = vld [vmem:[%s413_s0 + $0x7] sm:$0x1]  ;;  %v332_v1 = vld [vmem:[%s413_s0 + $0x6] sm:$0x1]  ;;  %v333_v2 = vld [vmem:[%s413_s0 + $0x5] sm:$0x1] }
   0x2   :  { %v143_v3 = vunpack.c.0.s8 %v331_v0  ;;  %v159_v4 = vunpack.c.0.s8 %v332_v1  ;;  %v175_v5 = vunpack.c.0.s8 %v333_v2  ;;  %v334_v6 = vld [vmem:[%s413_s0 + $0x4] sm:$0x1]  ;;  %v335_v7 = vld [vmem:[%s413_s0 + $0x3] sm:$0x1]  ;;  %v336_v8 = vld [vmem:[%s413_s0 + $0x2] sm:$0x1] }
   0x3   :  { %v191_v9 = vunpack.c.0.s8 %v334_v6  ;;  %v207_v10 = vunpack.c.0.s8 %v335_v7  ;;  %v223_v11 = vunpack.c.0.s8 %v336_v8  ;;  %v337_v12 = vld [vmem:[%s413_s0 + $0x1] sm:$0x1]  ;;  %v251_v13 = vld [vmem:[%s413_s0] sm:$0x1]  ;;  %v323_v16 = vld [vmem:[%s413_s0 + $0xf] sm:$0x1] }
   0x4   :  { %148 = vst [vmem:[#allocation1 + $0x38] sm:$0xf] %v143_v3  ;;  %164 = vst [vmem:[#allocation1 + $0x30] sm:$0xf] %v159_v4  ;;  %v238_v14 = vunpack.c.0.s8 %v337_v12  ;;  %v252_v15 = vunpack.c.0.s8 %v251_v13  ;;  %v324_v17 = vld [vmem:[%s413_s0 + $0xe] sm:$0x1]  ;;  %v15_v19 = vunpack.c.0.s8 %v323_v16 }
   0x5   :  { %180 = vst [vmem:[#allocation1 + $0x28] sm:$0xf] %v175_v5  ;;  %v325_v18 = vld [vmem:[%s413_s0 + $0xd] sm:$0x1]  ;;  %196 = vst [vmem:[#allocation1 + $0x20] sm:$0xf] %v191_v9  ;;  %v31_v20 = vunpack.c.0.s8 %v324_v17 }
   0x6   :  { %212 = vst [vmem:[#allocation1 + $0x18] sm:$0xf] %v207_v10  ;;  %228 = vst [vmem:[#allocation1 + $0x10] sm:$0xf] %v223_v11  ;;  %v47_v21 = vunpack.c.0.s8 %v325_v18  ;;  %v326_v22 = vld [vmem:[%s413_s0 + $0xc] sm:$0x1] }
   0x7   :  { %v327_v23 = vld [vmem:[%s413_s0 + $0xb] sm:$0x1]  ;;  %v328_v24 = vld [vmem:[%s413_s0 + $0xa] sm:$0x1]  ;;  %243 = vst [vmem:[#allocation1 + $0x8] sm:$0xf] %v238_v14  ;;  %v63_v25 = vunpack.c.0.s8 %v326_v22 }
   0x8   :  { %256 = vst [vmem:[#allocation1] sm:$0xf] %v252_v15  ;;  %v79_v26 = vunpack.c.0.s8 %v327_v23  ;;  %v95_v27 = vunpack.c.0.s8 %v328_v24  ;;  %v329_v28 = vld [vmem:[%s413_s0 + $0x9] sm:$0x1]  ;;  %v330_v29 = vld [vmem:[%s413_s0 + $0x8] sm:$0x1] }
   0x9   :  { %20 = vst [vmem:[#allocation1 + $0x78] sm:$0xf] %v15_v19  ;;  %36 = vst [vmem:[#allocation1 + $0x70] sm:$0xf] %v31_v20  ;;  %v111_v30 = vunpack.c.0.s8 %v329_v28  ;;  %v127_v31 = vunpack.c.0.s8 %v330_v29  ;;  %s341_s0 = smov 8  }
   0xa   :  { %52 = vst [vmem:[#allocation1 + $0x68] sm:$0xf] %v47_v21  ;;  %68 = vst [vmem:[#allocation1 + $0x60] sm:$0xf] %v63_v25 }
   0xb   :  { %84 = vst [vmem:[#allocation1 + $0x58] sm:$0xf] %v79_v26  ;;  %100 = vst [vmem:[#allocation1 + $0x50] sm:$0xf] %v95_v27 }
   0xc   :  { %116 = vst [vmem:[#allocation1 + $0x48] sm:$0xf] %v111_v30  ;;  %132 = vst [vmem:[#allocation1 + $0x40] sm:$0xf] %v127_v31 }
   0xd   :  { %v275_v32 = vld [vmem:[#allocation1 + $0x1] ss:$8 sm:$0xf0]   ;;  %v258_v33 = vld [vmem:[#allocation1] ss:$8 sm:$0xf0]  }
   0xf   :  { %v273_v34 = vld [vmem:[#allocation1 + $0x1] ss:$8 sm:$0xf]   ;;  %v257_v35 = vld [vmem:[#allocation1] ss:$8 sm:$0xf]  }
  0x10   :  { %v277_v36 = vsel %vm259_vm0, %v275_v32, %v273_v34  ;;  %v260_v37 = vsel %vm259_vm0, %v258_v33, %v257_v35 }
  0x11   :  { %278 = vrot.lane.b32.xlu0 %v277_v36, %s341_s0  ;;  %v285_v38 = vld [vmem:[#allocation1 + $0x41] ss:$8 sm:$0xf0]   ;;  %262 = vst.msk [vmem:[#allocation0] sm:$0xff] %vm261_vm1, %v260_v37  }
  0x12   :  { %v266_v39 = vld [vmem:[#allocation1 + $0x40] ss:$8 sm:$0xf0]  }
  0x13   :  { %v283_v40 = vld [vmem:[#allocation1 + $0x41] ss:$8 sm:$0xf]   ;;  %v264_v41 = vld [vmem:[#allocation1 + $0x40] ss:$8 sm:$0xf]  }
  0x14   :  { %v287_v42 = vsel %vm259_vm0, %v285_v38, %v283_v40  ;;  %v268_v43 = vsel %vm259_vm0, %v266_v39, %v264_v41 }
  0x15   :  { %271 = vst.msk [vmem:[#allocation0 + $0x8] sm:$0xff] %vm261_vm1, %v268_v43   ;;  %288 = vrot.lane.b32.xlu0 %v287_v42, %s341_s0 }
  0x83   :  { %v279_v44 = vpop.permute.xlu0 %278  }
  0x84   :  { %281 = vst.msk [vmem:[#allocation0] sm:$0xff] %vm280_vm2, %v279_v44  }
  0x87   :  { %v289_v45 = vpop.permute.xlu0 %288  }
  0x88   :  { %292 = vst.msk [vmem:[#allocation0 + $0x8] sm:$0xff] %vm280_vm2, %v289_v45  }
  0x8b   :  { %v297_v46 = vld [vmem:[#allocation0] sm:$0xff] }
  0x8c   :  { %v299_v48 = vpack.c.b16 %v342_v47, %v297_v46 }
  0x8e   :  { %v300_v49 = vpack.c.b8 %v342_v47, %v299_v48 }
  0x8f   :  { %v303_v50 = vld [vmem:[#allocation0 + $0x8] sm:$0xff] }
  0x90   :  { %301 = vst [vmem:[%s414_s1] sm:$0x3] %v300_v49  ;;  %v306_v51 = vpack.c.b16 %v342_v47, %v303_v50 }
  0x92   :  { %v307_v52 = vpack.c.b8 %v342_v47, %v306_v51 }
  0x94   :  { %338 = vst [vmem:[%s414_s1 + $0x2] sm:$0x3] %v307_v52 }

// kernel: decoder_block_cstm.1
= control target key start
LH: loop header
LB: loop body
LE: loop exit
PB: predicated region body
PF: predicated region fallthrough
CT: control target
= control target key end

     0   :  { %vm57_vm0 = vcmask 261120   ;;  %s10474_s0 = inlined_call_operand.vmem [shape: f32[16,32], index: 0, kind: input, shape index: {}]   ;;  %s10475_s1 = inlined_call_operand.vmem [shape: f32[16,16], index: 1, kind: input, shape index: {}]   ;;  %s10476_s2 = inlined_call_operand.vmem [shape: f32[32,96], index: 2, kind: input, shape index: {}]   ;;  %s10477_s3 = inlined_call_operand.vmem [shape: f32[1,96], index: 3, kind: input, shape index: {}]   ;;  %s10478_s4 = inlined_call_operand.vmem [shape: f32[32,32], index: 4, kind: input, shape index: {}]   ;;  %s10479_s5 = inlined_call_operand.vmem [shape: f32[1,32], index: 5, kind: input, shape index: {}]   ;;  %s10480_s6 = inlined_call_operand.vmem [shape: f32[32,64], index: 6, kind: input, shape index: {}]   ;;  %s10481_s7 = inlined_call_operand.vmem [shape: f32[1,64], index: 7, kind: input, shape index: {}]   ;;  %s10482_s8 = inlined_call_operand.vmem [shape: f32[64,32], index: 8, kind: input, shape index: {}]   ;;  %s10483_s9 = inlined_call_operand.vmem [shape: f32[1,32], index: 9, kind: input, shape index: {}]   ;;  %s10484_s10 = inlined_call_operand.vmem [shape: f32[1,32], index: 10, kind: input, shape index: {}]   ;;  %s10485_s11 = inlined_call_operand.vmem [shape: f32[1,32], index: 11, kind: input, shape index: {}]   ;;  %s10486_s12 = inlined_call_operand.hbm [shape: f32[16,32], index: 12, kind: output, shape index: {}]  }
   0x1   :  { %v46_v0 = vld [vmem:[%s10476_s2] sm:$0xff]  ;;  %v47_v1 = vld [vmem:[%s10476_s2 + $0x8] sm:$0xff]  ;;  %v48_v2 = vld [vmem:[%s10476_s2 + $0x10] sm:$0xff] }
   0x2   :  { %v65_v3 = vand.u32 4294901760, %v46_v0  ;;  %v68_v4 = vand.u32 4294901760, %v47_v1  ;;  %v49_v5 = vld [vmem:[%s10476_s2 + $0x18] sm:$0xff]  ;;  %v71_v6 = vand.u32 4294901760, %v48_v2  ;;  %v42_v7 = vld [vmem:[%s10474_s0] sm:$0xff]  ;;  %v43_v8 = vld [vmem:[%s10474_s0 + $0x8] sm:$0xff] }
   0x3   :  { %v74_v9 = vand.u32 4294901760, %v49_v5  ;;  %v59_v10 = vsel %vm57_vm0, %v42_v7, 0  ;;  %v62_v11 = vsel %vm57_vm0, %v43_v8, 0 }
   0x4   :  { %v9537_v12 = vpack.c.bf16 %v68_v4, %v65_v3  ;;  %v9539_v13 = vand.u32 4294901760, %v59_v10  ;;  %v9541_v14 = vand.u32 4294901760, %v62_v11  ;;  %v155_v15 = vsub.f32 %v46_v0, %v65_v3 }
   0x5   :  { %17 = vsyncpa [#allocation3], 0  ;;  %v9543_v16 = vpack.c.bf16 %v74_v9, %v71_v6  ;;  %v162_v17 = vsub.f32 %v47_v1, %v68_v4  ;;  %v169_v18 = vsub.f32 %v48_v2, %v71_v6  ;;  %v176_v19 = vsub.f32 %v49_v5, %v74_v9  ;;  %v7756_v46 = vld [vmem:[%s10477_s3] ss:$0 sm:$0xff]  ;;  %s9440_s16 = smov 112   ;;  %s9441_s17 = smov 120  }
   0x6   :  { %8787 = vmatprep.subr.bf16.mxu0 %v9537_v12  ;;  %v134_v20 = vsub.f32 %v59_v10, %v9539_v13  ;;  %v144_v21 = vsub.f32 %v62_v11, %v9541_v14  ;;  %v156_v22 = vand.u32 4294901760, %v155_v15  ;;  %s9442_s18 = smov 104   ;;  %s9443_s19 = smov 96   ;;  %v9444_v53 = vmov 1983009808  }
   0x7   :  { %8789 = vmatpush3.bf16.msra.mxu0 %v9537_v12  ;;  %v163_v23 = vand.u32 4294901760, %v162_v17  ;;  %v170_v24 = vand.u32 4294901760, %v169_v18  ;;  %v177_v25 = vand.u32 4294901760, %v176_v19  ;;  %v8802_v42 = vpack.c.bf16 %v162_v17, %v155_v15  ;;  %s9446_s3 = smov 64   ;;  %s9448_s24 = smov 8  }
   0x8   :  { %8791 = vmatprep.subr.bf16.mxu0 %v9543_v16  ;;  %v135_v26 = vand.u32 4294901760, %v134_v20  ;;  %v145_v27 = vand.u32 4294901760, %v144_v21  ;;  %v157_v28 = vsub.f32 %v155_v15, %v156_v22  ;;  %v8806_v43 = vpack.c.bf16 %v176_v19, %v169_v18  ;;  %s9449_s25 = smov 24   ;;  %s9450_s21 = smov [#allocation2]  }
   0x9   :  { %v164_v29 = vsub.f32 %v162_v17, %v163_v23  ;;  %v171_v30 = vsub.f32 %v169_v18, %v170_v24  ;;  %v178_v31 = vsub.f32 %v176_v19, %v177_v25  ;;  %v8818_v44 = vpack.c.bf16 %v163_v23, %v156_v22  ;;  %s7745_s22 = sshll.u32 %s9450_s21, 4  ;;  %s7746_s22 = int_to_ptr.vmem [resolvable:$true] %s7745_s22 }
   0xa   :  { %v136_v32 = vsub.f32 %v134_v20, %v135_v26  ;;  %v146_v33 = vsub.f32 %v144_v21, %v145_v27  ;;  %v158_v34 = vand.u32 4294901760, %v157_v28  ;;  %v8822_v45 = vpack.c.bf16 %v177_v25, %v170_v24  ;;  %s9416_s23 = scalar_lea.vmem %s7746_s22, 256  ;;  %p9421_p1 = scmp.lt.s32.totalorder %s7746_s22, %s7746_s22 }
   0xb   :  { %8793 = vmatpush3.bf16.msra.mxu0 %v9543_v16  ;;  %v165_v35 = vand.u32 4294901760, %v164_v29  ;;  %v172_v36 = vand.u32 4294901760, %v171_v30  ;;  %v179_v37 = vand.u32 4294901760, %v178_v31  ;;  %v615_v54 = vunpack.c.l.s4 %v9444_v53  ;;  %p9417_p0 = scmp.ne.s32.totalorder %s7746_s22, %s9416_s23  ;;  %p9422_p2 = scmp.lt.s32.totalorder %s9416_s23, %s9416_s23 }
   0xc   :  { %v137_v38 = vand.u32 4294901760, %v136_v32  ;;  %v147_v39 = vand.u32 4294901760, %v146_v33  ;;  %v617_v55 = vlaneseq  ;;  %v9445_v58 = vmov 1934713408  }
   0xd   :  { %v8794_v40 = vpack.c.bf16 %v165_v35, %v158_v34  ;;  %v8798_v41 = vpack.c.bf16 %v179_v37, %v172_v36  ;;  %v647_v59 = vunpack.c.l.s4 %v9445_v58  ;;  %v616_v60 = vunpack.c.0.s8 %v615_v54  ;;  %p9423_p3 = por %p9422_p2, %p9421_p1 }
   0xe   :  { %8146 = vmatprep.mubr.f32.mxu0 %v137_v38  ;;  %v618_v61 = vshrl.u32 %v617_v55, 7  ;;  %vm1476_vm1 = vcmask 64512   ;;  %vm3533_vm2 = vcmask 130048   ;;  %vm5954_vm3 = vcmask 195584  }
   0xf   :  { %8147 = vmatmul.mubr.f32.vlgmr.msra.gmra.mrb[0].mxu0 %v147_v39  ;;  %8795 = vmatprep.subr.bf16.mxu0 %v8794_v40  ;;  %v648_v0 = vunpack.c.0.s8 %v647_v59  ;;  %vm7149_vm8 = vcmask 523264   ;;  %p9424_p4 = pnand %p9423_p3, %p9417_p0 }
  0x10   :  { %8797 = vmatpush3.bf16.msra.mxu0 %v8794_v40  ;;  %8157 = vmatprep.mubr.f32.mxu0 %v9539_v13  ;;  %v9596_v3 = vsub.s32 %v616_v60, %v618_v61 }
  0x11   :  { %8799 = vmatprep.subr.bf16.mxu0 %v8798_v41  ;;  %v9610_v10 = vsub.s32 %v648_v0, %v618_v61 }
  0x14   :  { %8801 = vmatpush3.bf16.msra.mxu0 %v8798_v41 }
  0x15   :  { %8803 = vmatprep.subr.bf16.mxu0 %v8802_v42 }
  0x17   :  { %8158 = vmatmul.mubr.f32.vlgmr.msra.gmra.mrb[0].mxu0 %v9541_v14 }
  0x18   :  { %8805 = vmatpush3.bf16.msra.mxu0 %v8802_v42  ;;  %8168 = vmatprep.mubr.f32.mxu0 %v134_v20 }
  0x19   :  { %8807 = vmatprep.subr.bf16.mxu0 %v8806_v43 }
  0x1c   :  { %8809 = vmatpush3.bf16.msra.mxu0 %v8806_v43 }
  0x1d   :  { %8811 = vmatprep.subr.bf16.mxu0 %v9537_v12 }
  0x1f   :  { %8169 = vmatmul.mubr.f32.vlgmr.msra.gmra.mrb[0].mxu0 %v144_v21 }
  0x20   :  { %8813 = vmatpush3.bf16.msra.mxu0 %v9537_v12  ;;  %8179 = vmatprep.mubr.f32.mxu0 %v135_v26 }
  0x21   :  { %8815 = vmatprep.subr.bf16.mxu0 %v9543_v16 }
  0x24   :  { %8817 = vmatpush3.bf16.msra.mxu0 %v9543_v16 }
  0x25   :  { %8819 = vmatprep.subr.bf16.mxu0 %v8818_v44 }
  0x27   :  { %8180 = vmatmul.mubr.f32.vlgmr.msra.gmra.mrb[0].mxu0 %v145_v27 }
  0x28   :  { %8821 = vmatpush3.bf16.msra.mxu0 %v8818_v44  ;;  %8190 = vmatprep.mubr.f32.mxu0 %v9539_v13 }
  0x29   :  { %8823 = vmatprep.subr.bf16.mxu0 %v8822_v45 }
  0x2c   :  { %8825 = vmatpush3.bf16.msra.mxu0 %v8822_v45 }
  0x2d   :  { %8827 = vmatprep.subr.bf16.mxu0 %v9537_v12 }
  0x2f   :  { %8191 = vmatmul.mubr.f32.vlgmr.msra.gmra.mrb[0].mxu0 %v9541_v14 }
  0x30   :  { %8829 = vmatpush3.bf16.msra.mxu0 %v9537_v12  ;;  %8201 = vmatprep.mubr.f32.mxu0 %v9539_v13 }
  0x31   :  { %8831 = vmatprep.subr.bf16.mxu0 %v9543_v16 }
  0x34   :  { %8833 = vmatpush3.bf16.msra.mxu0 %v9543_v16 }
  0x37   :  { %8202 = vmatmul.mubr.f32.vlgmr.msra.gmra.mrb[0].mxu0 %v9541_v14 }
 0x10a   :  { %v8203_v47 = vpop.f32.mrb[0].mxu0 }
 0x10b   :  { %v9568_v48 = vadd.f32 %v8203_v47, %v7756_v46  ;;  %v582_v49 = vpop.f32.mrb[1].mxu0 }
 0x10c   :  { %v9219_v50 = vadd.f32 %v7756_v46, %v582_v49 }
 0x10d   :  { %602 = vrot.lane.b32.xlu1 %v9568_v48, %s9440_s16  ;;  %596 = vrot.lane.b32.xlu0 %v9568_v48, %s9441_s17 }
 0x111   :  { %600 = vrot.lane.b32.xlu1 %v9219_v50, %s9440_s16  ;;  %594 = vrot.lane.b32.xlu0 %v9219_v50, %s9441_s17 }
 0x115   :  { %608 = vrot.lane.b32.xlu1 %v9568_v48, %s9442_s18  ;;  %606 = vrot.lane.b32.xlu0 %v9219_v50, %s9442_s18 }
 0x119   :  { %886 = vrot.lane.b32.xlu1 %v9568_v48, %s9443_s19  ;;  %884 = vrot.lane.b32.xlu0 %v9219_v50, %s9443_s19 }
 0x17f   :  { %v9576_v51 = vpop.permute.xlu1 %602  ;;  %v9578_v52 = vpop.permute.xlu0 %596 }
 0x180   :  { %890 = vrot.lane.b32.xlu1 %v9578_v52, %s9443_s19  ;;  %v680_v58 = vcombine.low %v9568_v48, %v9576_v51  ;;  %v681_v59 = vcombine.high %v9568_v48, %v9576_v51 }
 0x183   :  { %v9582_v56 = vpop.permute.xlu1 %600  ;;  %v9584_v57 = vpop.permute.xlu0 %594 }
 0x184   :  { %894 = vrot.lane.b32.xlu1 %v9576_v51, %s9443_s19  ;;  %888 = vrot.lane.b32.xlu0 %v9584_v57, %s9443_s19  ;;  %v612_v62 = vcombine.low %v9219_v50, %v9582_v56  ;;  %v613_v63 = vcombine.high %v9219_v50, %v9582_v56 }
 0x186   :  { %v620_v8 = vrot.slane %v612_v62, %v9596_v3  ;;  %v627_v9 = vrot.slane %v613_v63, %v9596_v3  ;;  %v688_v62 = vrot.slane %v680_v58, %v9596_v3  ;;  %v695_v63 = vrot.slane %v681_v59, %v9596_v3 }
 0x187   :  { %v9592_v1 = vpop.permute.xlu1 %608  ;;  %v9594_v2 = vpop.permute.xlu0 %606 }
 0x188   :  { %v628_v4 = vcombine.low %v9584_v57, %v9594_v2  ;;  %v629_v5 = vcombine.high %v9584_v57, %v9594_v2  ;;  %898 = vrot.lane.b32.xlu1 %v9592_v1, %s9443_s19  ;;  %892 = vrot.lane.b32.xlu0 %v9582_v56, %s9443_s19  ;;  %v696_v54 = vcombine.low %v9578_v52, %v9592_v1 }
 0x189   :  { %v697_v55 = vcombine.high %v9578_v52, %v9592_v1 }
 0x18a   :  { %v636_v6 = vrot.slane %v628_v4, %v9596_v3  ;;  %v643_v7 = vrot.slane %v629_v5, %v9596_v3  ;;  %v704_v60 = vrot.slane %v696_v54, %v9596_v3 }
 0x18b   :  { %v711_v61 = vrot.slane %v697_v55, %v9596_v3 }
 0x18c   :  { %1180 = vrot.lane.b32.xlu1 %v9219_v50, %s9446_s3  ;;  %v644_v11 = vcombine.low %v620_v8, %v636_v6  ;;  %v645_v12 = vcombine.high %v620_v8, %v636_v6  ;;  %v660_v13 = vcombine.low %v627_v9, %v643_v7  ;;  %v661_v14 = vcombine.high %v627_v9, %v643_v7 }
 0x18d   :  { %896 = vrot.lane.b32.xlu0 %v9594_v2, %s9443_s19  ;;  %v712_v0 = vcombine.low %v688_v62, %v704_v60  ;;  %v713_v4 = vcombine.high %v688_v62, %v704_v60  ;;  %v728_v5 = vcombine.low %v695_v63, %v711_v61  ;;  %v729_v6 = vcombine.high %v695_v63, %v711_v61 }
 0x18e   :  { %v652_v15 = vrot.slane %v644_v11, %v9610_v10  ;;  %v659_v16 = vrot.slane %v645_v12, %v9610_v10  ;;  %v668_v17 = vrot.slane %v660_v13, %v9610_v10  ;;  %v675_v18 = vrot.slane %v661_v14, %v9610_v10  ;;  %v887_v12 = vpop.permute.xlu1 %886 }
 0x18f   :  { %v720_v7 = vrot.slane %v712_v0, %v9610_v10  ;;  %v727_v8 = vrot.slane %v713_v4, %v9610_v10  ;;  %v736_v9 = vrot.slane %v728_v5, %v9610_v10  ;;  %v743_v11 = vrot.slane %v729_v6, %v9610_v10 }
 0x190   :  { %v748_v19 = vcombine.low %v652_v15, %v659_v16  ;;  %v7757_v20 = vcombine.high %v652_v15, %v659_v16  ;;  %v764_v21 = vcombine.low %v668_v17, %v675_v18  ;;  %v7758_v22 = vcombine.high %v668_v17, %v675_v18  ;;  %v885_v17 = vpop.permute.xlu0 %884 }
 0x191   :  { %v816_v13 = vcombine.low %v720_v7, %v727_v8  ;;  %v7759_v14 = vcombine.high %v720_v7, %v727_v8  ;;  %v832_v15 = vcombine.low %v736_v9, %v743_v11  ;;  %v7760_v16 = vcombine.high %v736_v9, %v743_v11 }
 0x192   :  { %v755_v23 = vrot.slane %v748_v19, %v9596_v3  ;;  %v763_v24 = vrot.slane %v7757_v20, %v9596_v3  ;;  %v771_v25 = vrot.slane %v764_v21, %v9596_v3  ;;  %v779_v26 = vrot.slane %v7758_v22, %v9596_v3 }
 0x193   :  { %v9672_v19 = vrot.slane %v816_v13, %v9596_v3  ;;  %v9675_v20 = vrot.slane %v7759_v14, %v9596_v3  ;;  %v9678_v21 = vrot.slane %v832_v15, %v9596_v3  ;;  %v9681_v22 = vrot.slane %v7760_v16, %v9596_v3 }
 0x194   :  { %v780_v27 = vcombine.low %v755_v23, %v763_v24  ;;  %v796_v28 = vcombine.low %v771_v25, %v779_v26  ;;  %v781_v29 = vcombine.high %v755_v23, %v763_v24  ;;  %v797_v30 = vcombine.high %v771_v25, %v779_v26 }
 0x195   :  { %v848_v25 = vcombine.low %v9672_v19, %v9675_v20  ;;  %v864_v26 = vcombine.low %v9678_v21, %v9681_v22 }
 0x196   :  { %v788_v31 = vrot.slane %v780_v27, %v9610_v10  ;;  %v804_v32 = vrot.slane %v796_v28, %v9610_v10  ;;  %v9626_v33 = vrot.slane %v781_v29, %v9610_v10  ;;  %v9629_v34 = vrot.slane %v797_v30, %v9610_v10 }
 0x198   :  { %v812_v35 = vcombine.low %v788_v31, %v804_v32  ;;  %v813_v36 = vcombine.high %v788_v31, %v804_v32  ;;  %v814_v37 = vcombine.low %v9626_v33, %v9629_v34  ;;  %v815_v38 = vcombine.high %v9626_v33, %v9629_v34 }
 0x19a   :  { %v1478_v39 = vsel %vm1476_vm1, %v812_v35, 0  ;;  %v1992_v40 = vsel %vm1476_vm1, %v813_v36, 0  ;;  %v856_v35 = vrot.slane %v848_v25, %v9610_v10  ;;  %v872_v36 = vrot.slane %v864_v26, %v9610_v10 }
 0x19b   :  { %v9637_v41 = vand.u32 4294901760, %v1478_v39  ;;  %v9639_v42 = vand.u32 4294901760, %v1992_v40 }
 0x19c   :  { %v880_v63 = vcombine.low %v856_v35, %v872_v36 }
 0x19d   :  { %v9642_v43 = vsub.f32 %v1478_v39, %v9637_v41  ;;  %v9645_v44 = vsub.f32 %v1992_v40, %v9639_v42 }
 0x19f   :  { %v1558_v45 = vand.u32 4294901760, %v9642_v43  ;;  %v2072_v46 = vand.u32 4294901760, %v9645_v44 }
 0x1a1   :  { %v1559_v47 = vsub.f32 %v9642_v43, %v1558_v45  ;;  %v2073_v49 = vsub.f32 %v9645_v44, %v2072_v46 }
 0x1a3   :  { %v1560_v50 = vand.u32 4294901760, %v1559_v47  ;;  %v2074_v53 = vand.u32 4294901760, %v2073_v49 }
 0x1a5   :  { %8208 = vmatprep.mubr.f32.mxu1 %v1560_v50  ;;  %8250 = vmatprep.mubr.f32.mxu0 %v2074_v53 }
 0x1f2   :  { %v891_v18 = vpop.permute.xlu1 %890 }
 0x1f6   :  { %v895_v23 = vpop.permute.xlu1 %894  ;;  %v889_v24 = vpop.permute.xlu0 %888 }
 0x1f7   :  { %v976_v27 = vcombine.low %v887_v12, %v895_v23  ;;  %v977_v28 = vcombine.high %v887_v12, %v895_v23 }
 0x1f9   :  { %v984_v39 = vrot.slane %v976_v27, %v9596_v3  ;;  %v991_v40 = vrot.slane %v977_v28, %v9596_v3 }
 0x1fa   :  { %v899_v29 = vpop.permute.xlu1 %898  ;;  %v893_v32 = vpop.permute.xlu0 %892 }
 0x1fb   :  { %v992_v30 = vcombine.low %v891_v18, %v899_v29  ;;  %v993_v31 = vcombine.high %v891_v18, %v899_v29  ;;  %v908_v50 = vcombine.low %v885_v17, %v893_v32  ;;  %v909_v53 = vcombine.high %v885_v17, %v893_v32 }
 0x1fd   :  { %v1000_v47 = vrot.slane %v992_v30, %v9596_v3  ;;  %v1007_v49 = vrot.slane %v993_v31, %v9596_v3  ;;  %v916_v7 = vrot.slane %v908_v50, %v9596_v3  ;;  %v923_v8 = vrot.slane %v909_v53, %v9596_v3 }
 0x1ff   :  { %v1008_v54 = vcombine.low %v984_v39, %v1000_v47  ;;  %v1009_v55 = vcombine.high %v984_v39, %v1000_v47  ;;  %v1024_v58 = vcombine.low %v991_v40, %v1007_v49  ;;  %v1025_v59 = vcombine.high %v991_v40, %v1007_v49  ;;  %v897_v60 = vpop.permute.xlu0 %896 }
 0x200   :  { %v924_v61 = vcombine.low %v889_v24, %v897_v60  ;;  %v925_v62 = vcombine.high %v889_v24, %v897_v60  ;;  %v881_v40 = vcombine.high %v856_v35, %v872_v36 }
 0x201   :  { %v1016_v0 = vrot.slane %v1008_v54, %v9610_v10  ;;  %v1023_v4 = vrot.slane %v1009_v55, %v9610_v10  ;;  %v1032_v5 = vrot.slane %v1024_v58, %v9610_v10  ;;  %v1039_v6 = vrot.slane %v1025_v59, %v9610_v10 }
 0x202   :  { %v932_v9 = vrot.slane %v924_v61, %v9596_v3  ;;  %v939_v11 = vrot.slane %v925_v62, %v9596_v3  ;;  %v1481_v58 = vsel %vm1476_vm1, %v880_v63, 0 }
 0x203   :  { %v1112_v12 = vcombine.low %v1016_v0, %v1023_v4  ;;  %v7763_v13 = vcombine.high %v1016_v0, %v1023_v4  ;;  %v1128_v14 = vcombine.low %v1032_v5, %v1039_v6  ;;  %v7764_v15 = vcombine.high %v1032_v5, %v1039_v6 }
 0x204   :  { %v940_v16 = vcombine.low %v916_v7, %v932_v9  ;;  %v941_v17 = vcombine.high %v916_v7, %v932_v9  ;;  %v956_v18 = vcombine.low %v923_v8, %v939_v11  ;;  %v957_v23 = vcombine.high %v923_v8, %v939_v11 }
 0x205   :  { %v9702_v24 = vrot.slane %v1112_v12, %v9596_v3  ;;  %v9705_v25 = vrot.slane %v7763_v13, %v9596_v3  ;;  %v9708_v26 = vrot.slane %v1128_v14, %v9596_v3  ;;  %v9711_v27 = vrot.slane %v7764_v15, %v9596_v3 }
 0x206   :  { %v948_v28 = vrot.slane %v940_v16, %v9610_v10  ;;  %v955_v29 = vrot.slane %v941_v17, %v9610_v10  ;;  %v964_v30 = vrot.slane %v956_v18, %v9610_v10  ;;  %v971_v31 = vrot.slane %v957_v23, %v9610_v10 }
 0x207   :  { %v1144_v32 = vcombine.low %v9702_v24, %v9705_v25  ;;  %v1160_v39 = vcombine.low %v9708_v26, %v9711_v27  ;;  %v1995_v0 = vsel %vm1476_vm1, %v881_v40, 0  ;;  %v9743_v7 = vand.u32 4294901760, %v1481_v58 }
 0x208   :  { %v1044_v47 = vcombine.low %v948_v28, %v955_v29  ;;  %v7761_v49 = vcombine.high %v948_v28, %v955_v29  ;;  %v1060_v50 = vcombine.low %v964_v30, %v971_v31  ;;  %v7762_v53 = vcombine.high %v964_v30, %v971_v31 }
 0x209   :  { %v1152_v54 = vrot.slane %v1144_v32, %v9610_v10  ;;  %v1168_v55 = vrot.slane %v1160_v39, %v9610_v10  ;;  %v9747_v11 = vand.u32 4294901760, %v1995_v0  ;;  %v9750_v16 = vsub.f32 %v1481_v58, %v9743_v7 }
 0x20a   :  { %v9725_v59 = vrot.slane %v1044_v47, %v9596_v3  ;;  %v9728_v60 = vrot.slane %v7761_v49, %v9596_v3  ;;  %v9731_v61 = vrot.slane %v1060_v50, %v9596_v3  ;;  %v9734_v35 = vrot.slane %v7762_v53, %v9596_v3 }
 0x20b   :  { %v1176_v36 = vcombine.low %v1152_v54, %v1168_v55  ;;  %v1177_v62 = vcombine.high %v1152_v54, %v1168_v55  ;;  %v9759_v29 = vsub.f32 %v1995_v0, %v9747_v11  ;;  %v1568_v49 = vand.u32 4294901760, %v9750_v16 }
 0x20c   :  { %v1076_v4 = vcombine.low %v9725_v59, %v9728_v60  ;;  %v1092_v63 = vcombine.low %v9731_v61, %v9734_v35 }
 0x20d   :  { %v1487_v5 = vsel %vm1476_vm1, %v1176_v36, 0  ;;  %v2001_v6 = vsel %vm1476_vm1, %v1177_v62, 0  ;;  %v2082_v53 = vand.u32 4294901760, %v9759_v29  ;;  %v1569_v0 = vsub.f32 %v9750_v16, %v1568_v49 }
 0x20e   :  { %v1084_v8 = vrot.slane %v1076_v4, %v9610_v10  ;;  %v1100_v9 = vrot.slane %v1092_v63, %v9610_v10  ;;  %v1493_v12 = vand.u32 4294901760, %v1487_v5  ;;  %v2007_v13 = vand.u32 4294901760, %v2001_v6 }
 0x20f   :  { %v2083_v63 = vsub.f32 %v9759_v29, %v2082_v53 }
 0x210   :  { %v1108_v14 = vcombine.low %v1084_v8, %v1100_v9  ;;  %v1109_v15 = vcombine.high %v1084_v8, %v1100_v9  ;;  %v9752_v17 = vsub.f32 %v1487_v5, %v1493_v12  ;;  %v9754_v18 = vsub.f32 %v2001_v6, %v2007_v13 }
 0x212   :  { %v1484_v23 = vsel %vm1476_vm1, %v1108_v14, 0  ;;  %v1998_v28 = vsel %vm1476_vm1, %v1109_v15, 0  ;;  %v1586_v32 = vand.u32 4294901760, %v9752_v17  ;;  %v2100_v39 = vand.u32 4294901760, %v9754_v18 }
 0x213   :  { %v1490_v30 = vand.u32 4294901760, %v1484_v23  ;;  %v2004_v31 = vand.u32 4294901760, %v1998_v28  ;;  %v2084_v15 = vand.u32 4294901760, %v2083_v63 }
 0x214   :  { %v1587_v58 = vsub.f32 %v9752_v17, %v1586_v32  ;;  %v2101_v62 = vsub.f32 %v9754_v18, %v2100_v39 }
 0x215   :  { %v9763_v40 = vpack.c.bf16 %v1493_v12, %v1490_v30  ;;  %v9765_v47 = vpack.c.bf16 %v2007_v13, %v2004_v31  ;;  %v1578_v50 = vsub.f32 %v1484_v23, %v1490_v30  ;;  %v9769_v54 = vsub.f32 %v1998_v28, %v2004_v31 }
 0x216   :  { %v1588_v8 = vand.u32 4294901760, %v1587_v58  ;;  %v2102_v12 = vand.u32 4294901760, %v2101_v62  ;;  %v1570_v13 = vand.u32 4294901760, %v1569_v0  ;;  %v1077_v31 = vcombine.high %v9725_v59, %v9728_v60 }
 0x217   :  { %8835 = vmatprep.subr.bf16.mxu1 %v9763_v40  ;;  %8859 = vmatprep.subr.bf16.mxu0 %v9765_v47  ;;  %v1579_v55 = vand.u32 4294901760, %v1578_v50  ;;  %v2093_v36 = vand.u32 4294901760, %v9769_v54  ;;  %v8842_v28 = vpack.c.bf16 %v9752_v17, %v1578_v50  ;;  %v8866_v30 = vpack.c.bf16 %v9754_v18, %v9769_v54 }
 0x218   :  { %8837 = vmatpush3.bf16.xpose.msra.mxu1 %v9763_v40  ;;  %8861 = vmatpush3.bf16.xpose.msra.mxu0 %v9765_v47  ;;  %v1093_v58 = vcombine.high %v9731_v61, %v9734_v35  ;;  %v1145_v62 = vcombine.high %v9702_v24, %v9705_v25  ;;  %v865_v59 = vcombine.high %v9678_v21, %v9681_v22  ;;  %v2506_v18 = vsel %vm1476_vm1, %v814_v37, 0 }
 0x219   :  { %v1580_v4 = vsub.f32 %v1578_v50, %v1579_v55  ;;  %v2094_v5 = vsub.f32 %v9769_v54, %v2093_v36  ;;  %v1161_v50 = vcombine.high %v9708_v26, %v9711_v27  ;;  %v1091_v54 = vrot.slane %v1077_v31, %v9610_v10 }
 0x21a   :  { %v1107_v0 = vrot.slane %v1093_v58, %v9610_v10  ;;  %v1159_v24 = vrot.slane %v1145_v62, %v9610_v10  ;;  %v849_v27 = vcombine.high %v9672_v19, %v9675_v20  ;;  %v8874_v19 = vpack.c.bf16 %v2100_v39, %v2093_v36 }
 0x21b   :  { %v1581_v6 = vand.u32 4294901760, %v1580_v4  ;;  %v2095_v9 = vand.u32 4294901760, %v2094_v5  ;;  %v1175_v25 = vrot.slane %v1161_v50, %v9610_v10  ;;  %v8850_v4 = vpack.c.bf16 %v1586_v32, %v1579_v55 }
 0x21c   :  { %v1110_v26 = vcombine.low %v1091_v54, %v1107_v0  ;;  %v1111_v60 = vcombine.high %v1091_v54, %v1107_v0  ;;  %v863_v21 = vrot.slane %v849_v27, %v9610_v10  ;;  %v879_v22 = vrot.slane %v865_v59, %v9610_v10 }
 0x21d   :  { %v8838_v14 = vpack.c.bf16 %v1588_v8, %v1581_v6  ;;  %v8862_v23 = vpack.c.bf16 %v2102_v12, %v2095_v9  ;;  %v1178_v61 = vcombine.low %v1159_v24, %v1175_v25  ;;  %v1179_v35 = vcombine.high %v1159_v24, %v1175_v25 }
 0x21e   :  { %v2512_v63 = vsel %vm1476_vm1, %v1110_v26, 0  ;;  %v3026_v20 = vsel %vm1476_vm1, %v1111_v60, 0  ;;  %v882_v39 = vcombine.low %v863_v21, %v879_v22  ;;  %v9844_v36 = vand.u32 4294901760, %v2506_v18 }
 0x21f   :  { %8209 = vmatmul.mubr.f32.vlgmr.msra.gmra.mrb[0].mxu1 %v1570_v13  ;;  %8839 = vmatprep.subr.bf16.mxu1 %v8838_v14  ;;  %v2515_v17 = vsel %vm1476_vm1, %v1178_v61, 0  ;;  %v3032_v32 = vand.u32 4294901760, %v3026_v20  ;;  %v883_v5 = vcombine.high %v863_v21, %v879_v22 }
 0x220   :  { %8251 = vmatmul.mubr.f32.vlgmr.msra.gmra.mrb[2].mxu0 %v2084_v15  ;;  %8863 = vmatprep.subr.bf16.mxu0 %v8862_v23 }
 0x221   :  { %8841 = vmatpush3.bf16.xpose.msra.mxu1 %v8838_v14  ;;  %8215 = vmatprep.mubr.f32.mxu1 %v9637_v41  ;;  %v9853_v33 = vsub.f32 %v3026_v20, %v3032_v32 }
 0x222   :  { %8865 = vmatpush3.bf16.xpose.msra.mxu0 %v8862_v23  ;;  %8257 = vmatprep.mubr.f32.mxu0 %v9639_v42 }
 0x223   :  { %8843 = vmatprep.subr.bf16.mxu1 %v8842_v28  ;;  %8867 = vmatprep.subr.bf16.mxu0 %v8866_v30  ;;  %v3121_v9 = vand.u32 4294901760, %v9853_v33 }
 0x225   :  { %v3122_v62 = vsub.f32 %v9853_v33, %v3121_v9 }
 0x227   :  { %v3123_v24 = vand.u32 4294901760, %v3122_v62 }
 0x228   :  { %8216 = vmatmul.mubr.f32.vlgmr.msra.gmra.mrb[0].mxu1 %v9743_v7 }
 0x229   :  { %8258 = vmatmul.mubr.f32.vlgmr.msra.gmra.mrb[2].mxu0 %v9747_v11  ;;  %8845 = vmatpush3.bf16.xpose.msra.mxu1 %v8842_v28 }
 0x22a   :  { %8222 = vmatprep.mubr.f32.mxu1 %v9642_v43  ;;  %8869 = vmatpush3.bf16.xpose.msra.mxu0 %v8866_v30  ;;  %v3029_v43 = vsel %vm1476_vm1, %v1179_v35, 0 }
 0x22b   :  { %8264 = vmatprep.mubr.f32.mxu0 %v9645_v44  ;;  %8847 = vmatprep.subr.bf16.mxu1 %v9763_v40  ;;  %v3020_v44 = vsel %vm1476_vm1, %v815_v38, 0  ;;  %v3035_v55 = vand.u32 4294901760, %v3029_v43  ;;  %v2509_v38 = vsel %vm1476_vm1, %v882_v39, 0 }
 0x22c   :  { %8871 = vmatprep.subr.bf16.mxu0 %v9765_v47  ;;  %v9848_v37 = vand.u32 4294901760, %v3020_v44  ;;  %v9872_v12 = vand.u32 4294901760, %v2509_v38 }
 0x22d   :  { %v9890_v58 = vpack.c.bf16 %v3035_v55, %v3032_v32 }
 0x230   :  { %8223 = vmatmul.mubr.f32.vlgmr.msra.gmra.mrb[0].mxu1 %v9750_v16  ;;  %v9862_v16 = vsub.f32 %v2506_v18, %v9844_v36 }
 0x231   :  { %8265 = vmatmul.mubr.f32.vlgmr.msra.gmra.mrb[2].mxu0 %v9759_v29  ;;  %8849 = vmatpush3.bf16.xpose.msra.mxu1 %v9763_v40  ;;  %v9864_v29 = vsub.f32 %v3029_v43, %v3035_v55  ;;  %v45_v43 = vld [vmem:[%s10475_s1 + $0x8] sm:$0xff] }
 0x232   :  { %8229 = vmatprep.mubr.f32.mxu1 %v1558_v45  ;;  %8873 = vmatpush3.bf16.xpose.msra.mxu0 %v9765_v47  ;;  %v2518_v45 = vand.u32 4294901760, %v2512_v63  ;;  %v2586_v15 = vand.u32 4294901760, %v9862_v16 }
 0x233   :  { %8271 = vmatprep.mubr.f32.mxu0 %v2072_v46  ;;  %8851 = vmatprep.subr.bf16.mxu1 %v8850_v4  ;;  %v2521_v46 = vand.u32 4294901760, %v2515_v17  ;;  %v3128_v23 = vand.u32 4294901760, %v9864_v29 }
 0x234   :  { %8875 = vmatprep.subr.bf16.mxu0 %v8874_v19  ;;  %v9850_v6 = vsub.f32 %v2512_v63, %v2518_v45 }
 0x235   :  { %v9857_v34 = vsub.f32 %v2515_v17, %v2521_v46  ;;  %v9882_v28 = vpack.c.bf16 %v2521_v46, %v2518_v45  ;;  %v3129_v54 = vsub.f32 %v9864_v29, %v3128_v23  ;;  %v8922_v17 = vpack.c.bf16 %v3128_v23, %v3121_v9 }
 0x236   :  { %v2607_v8 = vand.u32 4294901760, %v9850_v6 }
 0x237   :  { %v2614_v13 = vand.u32 4294901760, %v9857_v34  ;;  %v3130_v60 = vand.u32 4294901760, %v3129_v54 }
 0x238   :  { %8230 = vmatmul.mubr.f32.vlgmr.msra.gmra.mrb[0].mxu1 %v1568_v49  ;;  %v3023_v49 = vsel %vm1476_vm1, %v883_v5, 0  ;;  %v2608_v31 = vsub.f32 %v9850_v6, %v2607_v8 }
 0x239   :  { %8272 = vmatmul.mubr.f32.vlgmr.msra.gmra.mrb[2].mxu0 %v2082_v53  ;;  %8853 = vmatpush3.bf16.xpose.msra.mxu1 %v8850_v4  ;;  %v9868_v53 = vsub.f32 %v3020_v44, %v9848_v37  ;;  %v9875_v14 = vand.u32 4294901760, %v3023_v49  ;;  %v2615_v50 = vsub.f32 %v9857_v34, %v2614_v13  ;;  %v8910_v4 = vpack.c.bf16 %v3130_v60, %v3123_v24  ;;  %v44_v44 = vld [vmem:[%s10475_s1] sm:$0xff]  ;;  %s9447_s1 = smov 16  }
 0x23a   :  { %8236 = vmatprep.mubr.f32.mxu1 %v9637_v41  ;;  %8877 = vmatpush3.bf16.xpose.msra.mxu0 %v8874_v19  ;;  %v2609_v0 = vand.u32 4294901760, %v2608_v31  ;;  %v8898_v22 = vpack.c.bf16 %v2614_v13, %v2607_v8  ;;  %v9983_v13 = vpop.permute.xlu1 %1180 }
 0x23b   :  { %8278 = vmatprep.mubr.f32.mxu0 %v9639_v42  ;;  %8855 = vmatprep.subr.bf16.mxu1 %v9763_v40  ;;  %v3100_v30 = vand.u32 4294901760, %v9868_v53  ;;  %v2616_v26 = vand.u32 4294901760, %v2615_v50 }
 0x23c   :  { %8879 = vmatprep.subr.bf16.mxu0 %v9765_v47 }
 0x23d   :  { %v8886_v35 = vpack.c.bf16 %v2616_v26, %v2609_v0 }
 0x240   :  { %8237 = vmatmul.mubr.f32.vlgmr.msra.gmra.mrb[0].mxu1 %v9743_v7 }
 0x241   :  { %8279 = vmatmul.mubr.f32.vlgmr.msra.gmra.mrb[2].mxu0 %v9747_v11  ;;  %8857 = vmatpush3.bf16.xpose.msra.mxu1 %v9763_v40  ;;  %v2595_v40 = vsub.f32 %v2509_v38, %v9872_v12 }
 0x242   :  { %8243 = vmatprep.mubr.f32.mxu1 %v9637_v41  ;;  %8881 = vmatpush3.bf16.xpose.msra.mxu0 %v9765_v47  ;;  %v3109_v41 = vsub.f32 %v3023_v49, %v9875_v14  ;;  %v2587_v47 = vsub.f32 %v9862_v16, %v2586_v15 }
 0x243   :  { %8285 = vmatprep.mubr.f32.mxu0 %v9639_v42  ;;  %8883 = vmatprep.subr.bf16.mxu1 %v9882_v28  ;;  %v3101_v42 = vsub.f32 %v9868_v53, %v3100_v30  ;;  %v2596_v25 = vand.u32 4294901760, %v2595_v40 }
 0x244   :  { %8907 = vmatprep.subr.bf16.mxu0 %v9890_v58  ;;  %v3110_v27 = vand.u32 4294901760, %v3109_v41  ;;  %v2588_v59 = vand.u32 4294901760, %v2587_v47 }
 0x245   :  { %v3102_v61 = vand.u32 4294901760, %v3101_v42  ;;  %v2597_v63 = vsub.f32 %v2595_v40, %v2596_v25 }
 0x246   :  { %v3111_v19 = vsub.f32 %v3109_v41, %v3110_v27 }
 0x247   :  { %v2598_v20 = vand.u32 4294901760, %v2597_v63 }
 0x248   :  { %8244 = vmatmul.mubr.f32.vlgmr.msra.gmra.mrb[0].mxu1 %v9743_v7  ;;  %v3112_v21 = vand.u32 4294901760, %v3111_v19  ;;  %v8890_v7 = vpack.c.bf16 %v9857_v34, %v9850_v6 }
 0x249   :  { %8286 = vmatmul.mubr.f32.vlgmr.msra.gmra.mrb[2].mxu0 %v9747_v11  ;;  %8885 = vmatpush3.bf16.xpose.msra.mxu1 %v9882_v28  ;;  %v8914_v11 = vpack.c.bf16 %v9864_v29, %v9853_v33 }
 0x24a   :  { %8292 = vmatprep.mubr.f32.mxu1 %v2588_v59  ;;  %8909 = vmatpush3.bf16.xpose.msra.mxu0 %v9890_v58 }
 0x24b   :  { %8334 = vmatprep.mubr.f32.mxu0 %v3102_v61  ;;  %8887 = vmatprep.subr.bf16.mxu1 %v8886_v35 }
 0x24c   :  { %8911 = vmatprep.subr.bf16.mxu0 %v8910_v4 }
 0x250   :  { %8293 = vmatmul.mubr.f32.vlgmr.msra.gmra.mrb[2].mxu1 %v2598_v20 }
 0x251   :  { %8335 = vmatmul.mubr.f32.vlgmr.msra.gmra.mrb[4].mxu0 %v3112_v21  ;;  %8889 = vmatpush3.bf16.xpose.msra.mxu1 %v8886_v35 }
 0x252   :  { %8299 = vmatprep.mubr.f32.mxu1 %v9844_v36  ;;  %8913 = vmatpush3.bf16.xpose.msra.mxu0 %v8910_v4 }
 0x253   :  { %8341 = vmatprep.mubr.f32.mxu0 %v9848_v37  ;;  %8891 = vmatprep.subr.bf16.mxu1 %v8890_v7 }
 0x254   :  { %8915 = vmatprep.subr.bf16.mxu0 %v8914_v11 }
 0x258   :  { %8300 = vmatmul.mubr.f32.vlgmr.msra.gmra.mrb[2].mxu1 %v9872_v12 }
 0x259   :  { %8342 = vmatmul.mubr.f32.vlgmr.msra.gmra.mrb[4].mxu0 %v9875_v14  ;;  %8893 = vmatpush3.bf16.xpose.msra.mxu1 %v8890_v7 }
 0x25a   :  { %8306 = vmatprep.mubr.f32.mxu1 %v9862_v16  ;;  %8917 = vmatpush3.bf16.xpose.msra.mxu0 %v8914_v11 }
 0x25b   :  { %8348 = vmatprep.mubr.f32.mxu0 %v9868_v53  ;;  %8895 = vmatprep.subr.bf16.mxu1 %v9882_v28 }
 0x25c   :  { %8919 = vmatprep.subr.bf16.mxu0 %v9890_v58 }
 0x260   :  { %8307 = vmatmul.mubr.f32.vlgmr.msra.gmra.mrb[2].mxu1 %v2595_v40 }
 0x261   :  { %8349 = vmatmul.mubr.f32.vlgmr.msra.gmra.mrb[4].mxu0 %v3109_v41  ;;  %8897 = vmatpush3.bf16.xpose.msra.mxu1 %v9882_v28 }
 0x262   :  { %8313 = vmatprep.mubr.f32.mxu1 %v2586_v15  ;;  %8921 = vmatpush3.bf16.xpose.msra.mxu0 %v9890_v58 }
 0x263   :  { %8355 = vmatprep.mubr.f32.mxu0 %v3100_v30  ;;  %8899 = vmatprep.subr.bf16.mxu1 %v8898_v22 }
 0x264   :  { %8923 = vmatprep.subr.bf16.mxu0 %v8922_v17 }
 0x268   :  { %8314 = vmatmul.mubr.f32.vlgmr.msra.gmra.mrb[2].mxu1 %v2596_v25 }
 0x269   :  { %8356 = vmatmul.mubr.f32.vlgmr.msra.gmra.mrb[4].mxu0 %v3110_v27  ;;  %8901 = vmatpush3.bf16.xpose.msra.mxu1 %v8898_v22 }
 0x26a   :  { %8320 = vmatprep.mubr.f32.mxu1 %v9844_v36  ;;  %8925 = vmatpush3.bf16.xpose.msra.mxu0 %v8922_v17 }
 0x26b   :  { %8362 = vmatprep.mubr.f32.mxu0 %v9848_v37  ;;  %8903 = vmatprep.subr.bf16.mxu1 %v9882_v28 }
 0x26c   :  { %8927 = vmatprep.subr.bf16.mxu0 %v9890_v58 }
 0x270   :  { %8321 = vmatmul.mubr.f32.vlgmr.msra.gmra.mrb[2].mxu1 %v9872_v12 }
 0x271   :  { %8363 = vmatmul.mubr.f32.vlgmr.msra.gmra.mrb[4].mxu0 %v9875_v14  ;;  %8905 = vmatpush3.bf16.xpose.msra.mxu1 %v9882_v28 }
 0x272   :  { %8327 = vmatprep.mubr.f32.mxu1 %v9844_v36  ;;  %8929 = vmatpush3.bf16.xpose.msra.mxu0 %v9890_v58 }
 0x273   :  { %8369 = vmatprep.mubr.f32.mxu0 %v9848_v37 }
 0x278   :  { %8328 = vmatmul.mubr.f32.vlgmr.msra.gmra.mrb[2].mxu1 %v9872_v12 }
 0x279   :  { %8370 = vmatmul.mubr.f32.vlgmr.msra.gmra.mrb[4].mxu0 %v9875_v14 }
 0x31b   :  { %v8245_v45 = vpop.f32.mrb[0].mxu1 }
 0x31c   :  { %v9220_v18 = vadd.f32 %v8245_v45, %v45_v43  ;;  %v8287_v32 = vpop.f32.mrb[2].mxu0  ;;  %v1981_v46 = vpop.f32.mrb[1].mxu1 }
 0x31d   :  { %v9222_v39 = vadd.f32 %v8287_v32, %v45_v43  ;;  %v2495_v55 = vpop.f32.mrb[3].mxu0  ;;  %v9221_v5 = vadd.f32 %v1981_v46, %v44_v44 }
 0x31e   :  { %v3537_v36 = vsel %vm3533_vm2, %v9220_v18, -inf  ;;  %v9223_v53 = vadd.f32 %v2495_v55, %v44_v44 }
 0x31f   :  { %v3543_v37 = vsel %vm3533_vm2, %v9222_v39, -inf  ;;  %3538 = vmax.xlane.f32.xlu1 %v3537_v36  ;;  %v3534_v6 = vsel %vm3533_vm2, %v9221_v5, -inf }
 0x320   :  { %3544 = vmax.xlane.f32.xlu0 %v3543_v37 }
 0x324   :  { %3535 = vmax.xlane.f32.xlu0 %v3534_v6 }
 0x330   :  { %1184 = vrot.lane.b32.xlu1 %v9584_v57, %s9446_s3  ;;  %v3540_v57 = vsel %vm3533_vm2, %v9223_v53, -inf }
 0x334   :  { %1186 = vrot.lane.b32.xlu1 %v9578_v52, %s9446_s3 }
 0x338   :  { %1190 = vrot.lane.b32.xlu1 %v9576_v51, %s9446_s3 }
 0x33a   :  { %1182 = vrot.lane.b32.xlu0 %v9568_v48, %s9446_s3 }
 0x34b   :  { %v8329_v33 = vpop.f32.mrb[2].mxu1 }
 0x34c   :  { %v9967_v34 = vadd.f32 %v8329_v33, %v45_v43  ;;  %v8371_v38 = vpop.f32.mrb[4].mxu0  ;;  %v3009_v16 = vpop.f32.mrb[3].mxu1 }
 0x34d   :  { %v3523_v29 = vpop.f32.mrb[5].mxu0  ;;  %v9971_v8 = vadd.f32 %v8371_v38, %v45_v43  ;;  %v9225_v52 = vadd.f32 %v3009_v16, %v44_v44 }
 0x34e   :  { %v9969_v49 = vadd.f32 %v3523_v29, %v44_v44  ;;  %v3549_v9 = vsel %vm3533_vm2, %v9967_v34, -inf }
 0x34f   :  { %v3555_v51 = vsel %vm3533_vm2, %v9971_v8, -inf  ;;  %v3546_v48 = vsel %vm3533_vm2, %v9225_v52, -inf }
 0x350   :  { %v3552_v12 = vsel %vm3533_vm2, %v9969_v49, -inf }
 0x359   :  { %3541 = vmax.xlane.f32.xlu0 %v3540_v57 }
 0x35c   :  { %3556 = vmax.xlane.f32.xlu1 %v3555_v51 }
 0x360   :  { %3547 = vmax.xlane.f32.xlu1 %v3546_v48 }
 0x36f   :  { %1188 = vrot.lane.b32.xlu0 %v9582_v56, %s9446_s3 }
 0x38e   :  { %3550 = vmax.xlane.f32.xlu0 %v3549_v9 }
 0x392   :  { %3553 = vmax.xlane.f32.xlu0 %v3552_v12 }
 0x3ac   :  { %v3539_v14 = vpop.xlane.xlu1 %3538 }
 0x3ad   :  { %v3545_v15 = vpop.xlane.xlu0 %3544  ;;  %v3559_v23 = vsub.f32 %v9220_v18, %v3539_v14 }
 0x3ae   :  { %v3561_v25 = vsub.f32 %v9222_v39, %v3545_v15 }
 0x3af   :  { %v3568_v28 = vmul.f32 1.442695, %v3559_v23 }
 0x3b0   :  { %v9985_v30 = vpop.permute.xlu1 %1184  ;;  %v3572_v26 = vmul.f32 1.442695, %v3561_v25 }
 0x3b1   :  { %9366 = vpow2.f32 %v3568_v28  ;;  %v3536_v31 = vpop.xlane.xlu0 %3535 }
 0x3b2   :  { %v3558_v58 = vsub.f32 %v9221_v5, %v3536_v31 }
 0x3b4   :  { %v3566_v56 = vmul.f32 1.442695, %v3558_v58  ;;  %v9987_v62 = vpop.permute.xlu1 %1186 }
 0x3b5   :  { %v9989_v40 = vpop.permute.xlu0 %1182 }
 0x3b6   :  { %9368 = vpow2.f32 %v3566_v56 }
 0x3b7   :  { %9370 = vpow2.f32 %v3572_v26 }
 0x3b8   :  { %v9991_v50 = vpop.permute.xlu1 %1190 }
 0x3b9   :  { %v1272_v41 = vcombine.low %v9989_v40, %v9991_v50  ;;  %v1273_v47 = vcombine.high %v9989_v40, %v9991_v50 }
 0x3bb   :  { %v9997_v54 = vpop.eup %9366  ;;  %v1280_v15 = vrot.slane %v1272_v41, %v9596_v3 }
 0x3bc   :  { %v3585_v42 = vsel %vm3533_vm2, %v9997_v54, 0.0 }
 0x3bd   :  { %3586 = vadd.xlane.f32.xlu0 %v3585_v42 }
 0x3c0   :  { %v10001_v0 = vpop.eup %9368 }
 0x3c1   :  { %v3582_v24 = vsel %vm3533_vm2, %v10001_v0, 0.0  ;;  %v10009_v19 = vpop.eup %9370 }
 0x3c2   :  { %3583 = vadd.xlane.f32.xlu1 %v3582_v24  ;;  %v1287_v24 = vrot.slane %v1273_v47, %v9596_v3 }
 0x3d3   :  { %1194 = vrot.lane.b32.xlu1 %v9592_v1, %s9446_s3  ;;  %1192 = vrot.lane.b32.xlu0 %v9594_v2, %s9446_s3  ;;  %v3591_v1 = vsel %vm3533_vm2, %v10009_v19, 0.0 }
 0x3e6   :  { %v3542_v27 = vpop.xlane.xlu0 %3541 }
 0x3e7   :  { %v3560_v59 = vsub.f32 %v9223_v53, %v3542_v27 }
 0x3e9   :  { %v3570_v60 = vmul.f32 1.442695, %v3560_v59  ;;  %v3557_v61 = vpop.xlane.xlu1 %3556 }
 0x3ea   :  { %v1189_v11 = vpop.permute.xlu0 %1188  ;;  %v3565_v43 = vsub.f32 %v9971_v8, %v3557_v61 }
 0x3eb   :  { %9372 = vpow2.f32 %v3570_v60  ;;  %v1205_v38 = vcombine.high %v9983_v13, %v1189_v11 }
 0x3ec   :  { %v3580_v44 = vmul.f32 1.442695, %v3565_v43 }
 0x3ed   :  { %v3548_v35 = vpop.xlane.xlu1 %3547  ;;  %v1219_v57 = vrot.slane %v1205_v38, %v9596_v3 }
 0x3ee   :  { %v3562_v4 = vsub.f32 %v9225_v52, %v3548_v35 }
 0x3f0   :  { %v3574_v63 = vmul.f32 1.442695, %v3562_v4 }
 0x3f2   :  { %9374 = vpow2.f32 %v3574_v63 }
 0x3f5   :  { %v10011_v20 = vpop.eup %9372 }
 0x3f6   :  { %v3588_v2 = vsel %vm3533_vm2, %v10011_v20, 0.0 }
 0x3f7   :  { %3592 = vadd.xlane.f32.xlu1 %v3591_v1  ;;  %3589 = vadd.xlane.f32.xlu0 %v3588_v2 }
 0x3fc   :  { %v10017_v21 = vpop.eup %9374 }
 0x3fd   :  { %v3594_v7 = vsel %vm3533_vm2, %v10017_v21, 0.0 }
 0x3fe   :  { %3595 = vadd.xlane.f32.xlu0 %v3594_v7 }
 0x41b   :  { %v3551_v22 = vpop.xlane.xlu0 %3550 }
 0x41c   :  { %v3563_v17 = vsub.f32 %v9967_v34, %v3551_v22  ;;  %v1204_v34 = vcombine.low %v9983_v13, %v1189_v11 }
 0x41e   :  { %v3576_v45 = vmul.f32 1.442695, %v3563_v17  ;;  %v1212_v8 = vrot.slane %v1204_v34, %v9596_v3 }
 0x41f   :  { %v3554_v18 = vpop.xlane.xlu0 %3553 }
 0x420   :  { %9376 = vpow2.f32 %v3576_v45  ;;  %v3564_v32 = vsub.f32 %v9969_v49, %v3554_v18 }
 0x422   :  { %v3578_v46 = vmul.f32 1.442695, %v3564_v32 }
 0x424   :  { %9378 = vpow2.f32 %v3578_v46 }
 0x425   :  { %9380 = vpow2.f32 %v3580_v44 }
 0x42a   :  { %v10024_v39 = vpop.eup %9376 }
 0x42b   :  { %v3597_v55 = vsel %vm3533_vm2, %v10024_v39, 0.0 }
 0x42c   :  { %3598 = vadd.xlane.f32.xlu1 %v3597_v55 }
 0x42e   :  { %v10028_v36 = vpop.eup %9378 }
 0x42f   :  { %v3600_v5 = vsel %vm3533_vm2, %v10028_v36, 0.0  ;;  %v10032_v37 = vpop.eup %9380 }
 0x430   :  { %3601 = vadd.xlane.f32.xlu0 %v3600_v5  ;;  %v3603_v6 = vsel %vm3533_vm2, %v10032_v37, 0.0 }
 0x434   :  { %3604 = vadd.xlane.f32.xlu0 %v3603_v6 }
 0x44a   :  { %v3587_v33 = vpop.xlane.xlu0 %3586 }
 0x44b   :  { %9382 = vrcp.f32 %v3587_v33 }
 0x44e   :  { %v1193_v16 = vpop.permute.xlu0 %1192 }
 0x44f   :  { %v3584_v29 = vpop.xlane.xlu1 %3583  ;;  %v1220_v49 = vcombine.low %v9985_v30, %v1193_v16  ;;  %v1221_v53 = vcombine.high %v9985_v30, %v1193_v16 }
 0x450   :  { %9384 = vrcp.f32 %v3584_v29 }
 0x451   :  { %v1228_v52 = vrot.slane %v1220_v49, %v9596_v3  ;;  %v1235_v51 = vrot.slane %v1221_v53, %v9596_v3 }
 0x453   :  { %v1236_v48 = vcombine.low %v1212_v8, %v1228_v52  ;;  %v1237_v9 = vcombine.high %v1212_v8, %v1228_v52  ;;  %v1252_v12 = vcombine.low %v1219_v57, %v1235_v51  ;;  %v1253_v14 = vcombine.high %v1219_v57, %v1235_v51  ;;  %v1195_v13 = vpop.permute.xlu1 %1194 }
 0x454   :  { %v1288_v23 = vcombine.low %v9987_v62, %v1195_v13  ;;  %v1289_v28 = vcombine.high %v9987_v62, %v1195_v13 }
 0x455   :  { %v9383_v30 = vpop.eup %9382  ;;  %v1244_v31 = vrot.slane %v1236_v48, %v9610_v10  ;;  %v1251_v58 = vrot.slane %v1237_v9, %v9610_v10  ;;  %v1260_v56 = vrot.slane %v1252_v12, %v9610_v10  ;;  %v1267_v42 = vrot.slane %v1253_v14, %v9610_v10 }
 0x456   :  { %v3609_v41 = vmul.f32 %v9383_v30, %v9997_v54  ;;  %v1296_v25 = vrot.slane %v1288_v23, %v9596_v3  ;;  %v1303_v62 = vrot.slane %v1289_v28, %v9596_v3 }
 0x457   :  { %v1340_v26 = vcombine.low %v1244_v31, %v1251_v58  ;;  %v7765_v27 = vcombine.high %v1244_v31, %v1251_v58  ;;  %v1356_v59 = vcombine.low %v1260_v56, %v1267_v42  ;;  %v7766_v60 = vcombine.high %v1260_v56, %v1267_v42 }
 0x458   :  { %v1304_v61 = vcombine.low %v1280_v15, %v1296_v25  ;;  %v1305_v35 = vcombine.high %v1280_v15, %v1296_v25  ;;  %v1320_v4 = vcombine.low %v1287_v24, %v1303_v62  ;;  %v1321_v63 = vcombine.high %v1287_v24, %v1303_v62 }
 0x459   :  { %v1347_v1 = vrot.slane %v1340_v26, %v9596_v3  ;;  %v1355_v2 = vrot.slane %v7765_v27, %v9596_v3  ;;  %v1363_v40 = vrot.slane %v1356_v59, %v9596_v3  ;;  %v1371_v50 = vrot.slane %v7766_v60, %v9596_v3 }
 0x45a   :  { %v9385_v47 = vpop.eup %9384  ;;  %v1312_v54 = vrot.slane %v1304_v61, %v9610_v10  ;;  %v1319_v7 = vrot.slane %v1305_v35, %v9610_v10  ;;  %v1328_v11 = vrot.slane %v1320_v4, %v9610_v10  ;;  %v1335_v22 = vrot.slane %v1321_v63, %v9610_v10 }
 0x45b   :  { %v3607_v17 = vmul.f32 %v9385_v47, %v10001_v0  ;;  %v1372_v43 = vcombine.low %v1347_v1, %v1355_v2  ;;  %v1373_v45 = vcombine.high %v1347_v1, %v1355_v2  ;;  %v1388_v18 = vcombine.low %v1363_v40, %v1371_v50 }
 0x45c   :  { %v1389_v32 = vcombine.high %v1363_v40, %v1371_v50  ;;  %v1408_v44 = vcombine.low %v1312_v54, %v1319_v7  ;;  %v7767_v46 = vcombine.high %v1312_v54, %v1319_v7  ;;  %v1424_v55 = vcombine.low %v1328_v11, %v1335_v22 }
 0x45d   :  { %v1380_v5 = vrot.slane %v1372_v43, %v9610_v10  ;;  %v1387_v6 = vrot.slane %v1373_v45, %v9610_v10  ;;  %v1396_v33 = vrot.slane %v1388_v18, %v9610_v10  ;;  %v7768_v34 = vcombine.high %v1328_v11, %v1335_v22 }
 0x45e   :  { %v1403_v38 = vrot.slane %v1389_v32, %v9610_v10  ;;  %v1415_v16 = vrot.slane %v1408_v44, %v9596_v3  ;;  %v1423_v0 = vrot.slane %v7767_v46, %v9596_v3  ;;  %v1431_v29 = vrot.slane %v1424_v55, %v9596_v3 }
 0x45f   :  { %v1404_v49 = vcombine.low %v1380_v5, %v1396_v33  ;;  %v1405_v53 = vcombine.high %v1380_v5, %v1396_v33  ;;  %v1439_v8 = vrot.slane %v7768_v34, %v9596_v3  ;;  %v3623_v57 = vsel %vm3533_vm2, %v3607_v17, 0 }
 0x460   :  { %v1406_v52 = vcombine.low %v1387_v6, %v1403_v38  ;;  %v10079_v51 = vcombine.high %v1387_v6, %v1403_v38  ;;  %v1440_v48 = vcombine.low %v1415_v16, %v1423_v0  ;;  %v1441_v9 = vcombine.high %v1415_v16, %v1423_v0 }
 0x461   :  { %v1456_v12 = vcombine.low %v1431_v29, %v1439_v8  ;;  %v1457_v14 = vcombine.high %v1431_v29, %v1439_v8  ;;  %v10081_v13 = vand.u32 4294901760, %v3623_v57  ;;  %v3629_v15 = vand.u32 4294901760, %v1404_v49 }
 0x462   :  { %v1448_v23 = vrot.slane %v1440_v48, %v9610_v10  ;;  %v1455_v28 = vrot.slane %v1441_v9, %v9610_v10  ;;  %v4645_v30 = vand.u32 4294901760, %v1406_v52  ;;  %v3626_v31 = vsel %vm3533_vm2, %v3609_v41, 0 }
 0x463   :  { %v1464_v58 = vrot.slane %v1456_v12, %v9610_v10  ;;  %v1471_v56 = vrot.slane %v1457_v14, %v9610_v10  ;;  %v10089_v42 = vsub.f32 %v3623_v57, %v10081_v13  ;;  %v10091_v24 = vand.u32 4294901760, %v3626_v31 }
 0x464   :  { %v3717_v25 = vsub.f32 %v1404_v49, %v3629_v15  ;;  %v10093_v62 = vsub.f32 %v1406_v52, %v4645_v30  ;;  %v4137_v26 = vand.u32 4294901760, %v1405_v53  ;;  %v5153_v27 = vand.u32 4294901760, %v10079_v51 }
 0x465   :  { %v1472_v59 = vcombine.low %v1448_v23, %v1464_v58  ;;  %v1473_v60 = vcombine.high %v1448_v23, %v1464_v58  ;;  %v1474_v61 = vcombine.low %v1455_v28, %v1471_v56  ;;  %v1475_v35 = vcombine.high %v1455_v28, %v1471_v56 }
 0x466   :  { %v3697_v41 = vand.u32 4294901760, %v10089_v42  ;;  %v10098_v4 = vsub.f32 %v3626_v31, %v10091_v24  ;;  %v3718_v63 = vand.u32 4294901760, %v3717_v25  ;;  %v4734_v1 = vand.u32 4294901760, %v10093_v62 }
 0x467   :  { %v3632_v2 = vand.u32 4294901760, %v1472_v59  ;;  %v4648_v40 = vand.u32 4294901760, %v1474_v61  ;;  %v4140_v50 = vand.u32 4294901760, %v1473_v60  ;;  %v4225_v47 = vsub.f32 %v1405_v53, %v4137_v26 }
 0x468   :  { %v3698_v54 = vsub.f32 %v10089_v42, %v3697_v41  ;;  %v3707_v7 = vand.u32 4294901760, %v10098_v4  ;;  %v3719_v11 = vsub.f32 %v3717_v25, %v3718_v63  ;;  %v4735_v22 = vsub.f32 %v10093_v62, %v4734_v1 }
 0x469   :  { %v10106_v17 = vpack.c.bf16 %v3632_v2, %v3629_v15  ;;  %v10108_v43 = vpack.c.bf16 %v4648_v40, %v4645_v30  ;;  %v3724_v45 = vsub.f32 %v1472_v59, %v3632_v2  ;;  %v4740_v18 = vsub.f32 %v1474_v61, %v4648_v40 }
 0x46a   :  { %v3699_v32 = vand.u32 4294901760, %v3698_v54  ;;  %v3708_v44 = vsub.f32 %v10098_v4, %v3707_v7  ;;  %v3720_v46 = vand.u32 4294901760, %v3719_v11  ;;  %v4736_v55 = vand.u32 4294901760, %v4735_v22 }
 0x46b   :  { %8931 = vmatprep.subr.bf16.mxu1 %v10106_v17  ;;  %8979 = vmatprep.subr.bf16.mxu0 %v10108_v43  ;;  %v3725_v5 = vand.u32 4294901760, %v3724_v45  ;;  %v4741_v6 = vand.u32 4294901760, %v4740_v18  ;;  %v8938_v33 = vpack.c.bf16 %v3724_v45, %v3717_v25  ;;  %v10115_v34 = vpack.c.bf16 %v4140_v50, %v4137_v26 }
 0x46c   :  { %8376 = vmatprep.mubr.f32.mxu1 %v3699_v32  ;;  %8933 = vmatpush3.bf16.msra.mxu1 %v10106_v17  ;;  %v3709_v38 = vand.u32 4294901760, %v3708_v44  ;;  %v4226_v16 = vand.u32 4294901760, %v4225_v47  ;;  %v4232_v0 = vsub.f32 %v1473_v60, %v4140_v50  ;;  %v5156_v29 = vand.u32 4294901760, %v1475_v35 }
 0x46d   :  { %8981 = vmatpush3.bf16.msra.mxu0 %v10108_v43  ;;  %v3726_v49 = vsub.f32 %v3724_v45, %v3725_v5  ;;  %v4742_v53 = vsub.f32 %v4740_v18, %v4741_v6  ;;  %v8946_v8 = vpack.c.bf16 %v3725_v5, %v3718_v63  ;;  %v5241_v57 = vsub.f32 %v10079_v51, %v5153_v27 }
 0x46e   :  { %v4227_v52 = vsub.f32 %v4225_v47, %v4226_v16  ;;  %v4233_v48 = vand.u32 4294901760, %v4232_v0  ;;  %v10120_v9 = vpack.c.bf16 %v4232_v0, %v4225_v47  ;;  %v10122_v12 = vpack.c.bf16 %v5156_v29, %v5153_v27 }
 0x46f   :  { %8377 = vmatmul.mubr.f32.vlgmr.msra.gmra.mrb[4].mxu1 %v3709_v38  ;;  %v3727_v14 = vand.u32 4294901760, %v3726_v49  ;;  %v4743_v15 = vand.u32 4294901760, %v4742_v53  ;;  %v5242_v23 = vand.u32 4294901760, %v5241_v57  ;;  %v5248_v28 = vsub.f32 %v1475_v35, %v5156_v29 }
 0x470   :  { %8383 = vmatprep.mubr.f32.mxu1 %v10081_v13  ;;  %v4234_v30 = vsub.f32 %v4232_v0, %v4233_v48  ;;  %v10125_v31 = vpack.c.bf16 %v4233_v48, %v4226_v16  ;;  %v10128_v58 = vpack.c.bf16 %v4740_v18, %v10093_v62  ;;  %v4228_v27 = vand.u32 4294901760, %v4227_v52 }
 0x471   :  { %v8934_v51 = vpack.c.bf16 %v3727_v14, %v3720_v46  ;;  %v10130_v56 = vpack.c.bf16 %v4743_v15, %v4736_v55  ;;  %v5243_v25 = vsub.f32 %v5241_v57, %v5242_v23  ;;  %v5249_v26 = vand.u32 4294901760, %v5248_v28 }
 0x472   :  { %v4235_v59 = vand.u32 4294901760, %v4234_v30  ;;  %v10132_v60 = vpack.c.bf16 %v5248_v28, %v5241_v57  ;;  %v10134_v61 = vpack.c.bf16 %v4741_v6, %v4734_v1 }
 0x473   :  { %8935 = vmatprep.subr.bf16.mxu1 %v8934_v51  ;;  %8983 = vmatprep.subr.bf16.mxu0 %v10130_v56  ;;  %v5250_v35 = vsub.f32 %v5248_v28, %v5249_v26  ;;  %v10137_v63 = vpack.c.bf16 %v5249_v26, %v5242_v23  ;;  %v5244_v2 = vand.u32 4294901760, %v5243_v25 }
 0x474   :  { %8937 = vmatpush3.bf16.msra.mxu1 %v8934_v51  ;;  %v8958_v62 = vpack.c.bf16 %v4235_v59, %v4228_v27 }
 0x475   :  { %8939 = vmatprep.subr.bf16.mxu1 %v8938_v33  ;;  %v5251_v40 = vand.u32 4294901760, %v5250_v35 }
 0x477   :  { %8384 = vmatmul.mubr.f32.vlgmr.msra.gmra.mrb[4].mxu1 %v10091_v24  ;;  %v10140_v50 = vpack.c.bf16 %v5251_v40, %v5244_v2 }
 0x478   :  { %8941 = vmatpush3.bf16.msra.mxu1 %v8938_v33  ;;  %8390 = vmatprep.mubr.f32.mxu1 %v10089_v42 }
 0x479   :  { %8943 = vmatprep.subr.bf16.mxu1 %v10106_v17 }
 0x47f   :  { %8391 = vmatmul.mubr.f32.vlgmr.msra.gmra.mrb[4].mxu1 %v10098_v4 }
 0x480   :  { %8945 = vmatpush3.bf16.msra.mxu1 %v10106_v17  ;;  %8397 = vmatprep.mubr.f32.mxu1 %v3697_v41 }
 0x481   :  { %8947 = vmatprep.subr.bf16.mxu1 %v8946_v8 }
 0x484   :  { %v3593_v1 = vpop.xlane.xlu1 %3592  ;;  %v3590_v47 = vpop.xlane.xlu0 %3589 }
 0x485   :  { %9386 = vrcp.f32 %v3593_v1 }
 0x486   :  { %9388 = vrcp.f32 %v3590_v47 }
 0x487   :  { %8398 = vmatmul.mubr.f32.vlgmr.msra.gmra.mrb[4].mxu1 %v3707_v7 }
 0x488   :  { %8949 = vmatpush3.bf16.msra.mxu1 %v8946_v8  ;;  %8404 = vmatprep.mubr.f32.mxu1 %v10081_v13 }
 0x489   :  { %8951 = vmatprep.subr.bf16.mxu1 %v10106_v17 }
 0x48b   :  { %v3596_v54 = vpop.xlane.xlu0 %3595 }
 0x48c   :  { %9390 = vrcp.f32 %v3596_v54 }
 0x48f   :  { %v9387_v11 = vpop.eup %9386  ;;  %8405 = vmatmul.mubr.f32.vlgmr.msra.gmra.mrb[4].mxu1 %v10091_v24 }
 0x490   :  { %v9389_v42 = vpop.eup %9388  ;;  %v3613_v41 = vmul.f32 %v9387_v11, %v10009_v19  ;;  %8953 = vmatpush3.bf16.msra.mxu1 %v10106_v17  ;;  %8411 = vmatprep.mubr.f32.mxu1 %v10081_v13 }
 0x491   :  { %v3611_v4 = vmul.f32 %v9389_v42, %v10011_v20  ;;  %8955 = vmatprep.subr.bf16.mxu1 %v10115_v34 }
 0x492   :  { %v4134_v7 = vsel %vm3533_vm2, %v3613_v41, 0 }
 0x493   :  { %v4131_v22 = vsel %vm3533_vm2, %v3611_v4, 0  ;;  %v4213_v45 = vand.u32 4294901760, %v4134_v7 }
 0x494   :  { %v4203_v18 = vand.u32 4294901760, %v4131_v22 }
 0x495   :  { %v4214_v32 = vsub.f32 %v4134_v7, %v4213_v45 }
 0x496   :  { %v9391_v44 = vpop.eup %9390  ;;  %v4204_v46 = vsub.f32 %v4131_v22, %v4203_v18 }
 0x497   :  { %v3615_v55 = vmul.f32 %v9391_v44, %v10017_v21  ;;  %8412 = vmatmul.mubr.f32.vlgmr.msra.gmra.mrb[4].mxu1 %v10091_v24  ;;  %v4215_v19 = vand.u32 4294901760, %v4214_v32 }
 0x498   :  { %8957 = vmatpush3.bf16.msra.mxu1 %v10115_v34  ;;  %v4205_v13 = vand.u32 4294901760, %v4204_v46 }
 0x499   :  { %8959 = vmatprep.subr.bf16.mxu1 %v8958_v62  ;;  %v4216_v20 = vsub.f32 %v4214_v32, %v4215_v19  ;;  %v4639_v17 = vsel %vm3533_vm2, %v3615_v55, 0 }
 0x49a   :  { %v4206_v5 = vsub.f32 %v4204_v46, %v4205_v13  ;;  %v10164_v6 = vand.u32 4294901760, %v4639_v17 }
 0x49b   :  { %v4217_v33 = vand.u32 4294901760, %v4216_v20 }
 0x49c   :  { %v4207_v38 = vand.u32 4294901760, %v4206_v5  ;;  %v10167_v16 = vsub.f32 %v4639_v17, %v10164_v6 }
 0x49e   :  { %8418 = vmatprep.mubr.f32.mxu1 %v4207_v38  ;;  %v4713_v21 = vand.u32 4294901760, %v10167_v16 }
 0x49f   :  { %8419 = vmatmul.mubr.f32.vlgmr.msra.gmra.mrb[6].mxu1 %v4217_v33 }
 0x4a0   :  { %8961 = vmatpush3.bf16.msra.mxu1 %v8958_v62  ;;  %8425 = vmatprep.mubr.f32.mxu1 %v4203_v18  ;;  %v4714_v24 = vsub.f32 %v10167_v16, %v4713_v21 }
 0x4a1   :  { %8963 = vmatprep.subr.bf16.mxu1 %v10120_v9 }
 0x4a2   :  { %v4715_v0 = vand.u32 4294901760, %v4714_v24 }
 0x4a4   :  { %8460 = vmatprep.mubr.f32.mxu0 %v4715_v0 }
 0x4a7   :  { %8426 = vmatmul.mubr.f32.vlgmr.msra.gmra.mrb[6].mxu1 %v4213_v45 }
 0x4a8   :  { %8965 = vmatpush3.bf16.msra.mxu1 %v10120_v9  ;;  %8432 = vmatprep.mubr.f32.mxu1 %v4204_v46 }
 0x4a9   :  { %8967 = vmatprep.subr.bf16.mxu1 %v10115_v34 }
 0x4af   :  { %8433 = vmatmul.mubr.f32.vlgmr.msra.gmra.mrb[6].mxu1 %v4214_v32 }
 0x4b0   :  { %8969 = vmatpush3.bf16.msra.mxu1 %v10115_v34  ;;  %8439 = vmatprep.mubr.f32.mxu1 %v4205_v13 }
 0x4b1   :  { %8971 = vmatprep.subr.bf16.mxu1 %v10125_v31 }
 0x4b7   :  { %8440 = vmatmul.mubr.f32.vlgmr.msra.gmra.mrb[6].mxu1 %v4215_v19 }
 0x4b8   :  { %8973 = vmatpush3.bf16.msra.mxu1 %v10125_v31  ;;  %8446 = vmatprep.mubr.f32.mxu1 %v4203_v18 }
 0x4b9   :  { %8975 = vmatprep.subr.bf16.mxu1 %v10115_v34  ;;  %v3599_v29 = vpop.xlane.xlu1 %3598 }
 0x4ba   :  { %9392 = vrcp.f32 %v3599_v29 }
 0x4bd   :  { %v3602_v49 = vpop.xlane.xlu0 %3601 }
 0x4be   :  { %9394 = vrcp.f32 %v3602_v49 }
 0x4bf   :  { %8447 = vmatmul.mubr.f32.vlgmr.msra.gmra.mrb[6].mxu1 %v4213_v45 }
 0x4c0   :  { %8977 = vmatpush3.bf16.msra.mxu1 %v10115_v34  ;;  %8453 = vmatprep.mubr.f32.mxu1 %v4203_v18 }
 0x4c1   :  { %9003 = vmatprep.subr.bf16.mxu1 %v10122_v12  ;;  %v3605_v53 = vpop.xlane.xlu0 %3604 }
 0x4c2   :  { %9396 = vrcp.f32 %v3605_v53 }
 0x4c4   :  { %v9393_v8 = vpop.eup %9392 }
 0x4c5   :  { %v3617_v57 = vmul.f32 %v9393_v8, %v10024_v39 }
 0x4c7   :  { %8454 = vmatmul.mubr.f32.vlgmr.msra.gmra.mrb[6].mxu1 %v4213_v45  ;;  %v4642_v52 = vsel %vm3533_vm2, %v3617_v57, 0 }
 0x4c8   :  { %v9395_v48 = vpop.eup %9394  ;;  %9005 = vmatpush3.bf16.msra.mxu1 %v10122_v12  ;;  %v4721_v9 = vand.u32 4294901760, %v4642_v52 }
 0x4c9   :  { %v3619_v14 = vmul.f32 %v9395_v48, %v10028_v36  ;;  %9007 = vmatprep.subr.bf16.mxu1 %v10140_v50 }
 0x4ca   :  { %v4722_v34 = vsub.f32 %v4642_v52, %v4721_v9 }
 0x4cb   :  { %v5147_v15 = vsel %vm3533_vm2, %v3619_v14, 0 }
 0x4cc   :  { %v9397_v23 = vpop.eup %9396  ;;  %v4723_v28 = vand.u32 4294901760, %v4722_v34  ;;  %v5219_v30 = vand.u32 4294901760, %v5147_v15 }
 0x4cd   :  { %v3621_v31 = vmul.f32 %v9397_v23, %v10032_v37 }
 0x4ce   :  { %v4724_v39 = vsub.f32 %v4722_v34, %v4723_v28  ;;  %v5220_v51 = vsub.f32 %v5147_v15, %v5219_v30 }
 0x4cf   :  { %v5150_v25 = vsel %vm3533_vm2, %v3621_v31, 0 }
 0x4d0   :  { %v4725_v26 = vand.u32 4294901760, %v4724_v39  ;;  %v5221_v27 = vand.u32 4294901760, %v5220_v51  ;;  %v5229_v59 = vand.u32 4294901760, %v5150_v25 }
 0x4d2   :  { %8461 = vmatmul.mubr.f32.vlgmr.msra.gmra.mrb[6].mxu0 %v4725_v26  ;;  %v5222_v35 = vsub.f32 %v5220_v51, %v5221_v27  ;;  %v5230_v36 = vsub.f32 %v5150_v25, %v5229_v59 }
 0x4d3   :  { %8985 = vmatpush3.bf16.msra.mxu0 %v10130_v56  ;;  %8467 = vmatprep.mubr.f32.mxu0 %v10164_v6 }
 0x4d4   :  { %8987 = vmatprep.subr.bf16.mxu0 %v10128_v58  ;;  %v5223_v62 = vand.u32 4294901760, %v5222_v35  ;;  %v5231_v2 = vand.u32 4294901760, %v5230_v36 }
 0x4d6   :  { %8502 = vmatprep.mubr.f32.mxu1 %v5223_v62  ;;  %v5232_v37 = vsub.f32 %v5230_v36, %v5231_v2 }
 0x4d8   :  { %v5233_v40 = vand.u32 4294901760, %v5232_v37 }
 0x4da   :  { %8468 = vmatmul.mubr.f32.vlgmr.msra.gmra.mrb[6].mxu0 %v4721_v9  ;;  %8503 = vmatmul.mubr.f32.vlgmr.msra.gmra.mrb[8].mxu1 %v5233_v40 }
 0x4db   :  { %8989 = vmatpush3.bf16.msra.mxu0 %v10128_v58  ;;  %9009 = vmatpush3.bf16.msra.mxu1 %v10140_v50 }
 0x4dc   :  { %8474 = vmatprep.mubr.f32.mxu0 %v10167_v16  ;;  %8991 = vmatprep.subr.bf16.mxu0 %v10108_v43 }
 0x4dd   :  { %8509 = vmatprep.mubr.f32.mxu1 %v5219_v30  ;;  %9011 = vmatprep.subr.bf16.mxu1 %v10132_v60 }
 0x4e2   :  { %8475 = vmatmul.mubr.f32.vlgmr.msra.gmra.mrb[6].mxu0 %v4722_v34  ;;  %8510 = vmatmul.mubr.f32.vlgmr.msra.gmra.mrb[8].mxu1 %v5229_v59 }
 0x4e3   :  { %8993 = vmatpush3.bf16.msra.mxu0 %v10108_v43  ;;  %9013 = vmatpush3.bf16.msra.mxu1 %v10132_v60 }
 0x4e4   :  { %8481 = vmatprep.mubr.f32.mxu0 %v4713_v21  ;;  %8995 = vmatprep.subr.bf16.mxu0 %v10134_v61 }
 0x4e5   :  { %8516 = vmatprep.mubr.f32.mxu1 %v5220_v51  ;;  %9015 = vmatprep.subr.bf16.mxu1 %v10122_v12 }
 0x4ea   :  { %8482 = vmatmul.mubr.f32.vlgmr.msra.gmra.mrb[6].mxu0 %v4723_v28  ;;  %8517 = vmatmul.mubr.f32.vlgmr.msra.gmra.mrb[8].mxu1 %v5230_v36 }
 0x4eb   :  { %8997 = vmatpush3.bf16.msra.mxu0 %v10134_v61  ;;  %9017 = vmatpush3.bf16.msra.mxu1 %v10122_v12 }
 0x4ec   :  { %8488 = vmatprep.mubr.f32.mxu0 %v10164_v6  ;;  %8999 = vmatprep.subr.bf16.mxu0 %v10108_v43 }
 0x4ed   :  { %8523 = vmatprep.mubr.f32.mxu1 %v5221_v27  ;;  %9019 = vmatprep.subr.bf16.mxu1 %v10137_v63 }
 0x4f2   :  { %8489 = vmatmul.mubr.f32.vlgmr.msra.gmra.mrb[6].mxu0 %v4721_v9  ;;  %8524 = vmatmul.mubr.f32.vlgmr.msra.gmra.mrb[8].mxu1 %v5231_v2 }
 0x4f3   :  { %9001 = vmatpush3.bf16.msra.mxu0 %v10108_v43  ;;  %9021 = vmatpush3.bf16.msra.mxu1 %v10137_v63 }
 0x4f4   :  { %8495 = vmatprep.mubr.f32.mxu0 %v10164_v6  ;;  %8530 = vmatprep.mubr.f32.mxu1 %v5219_v30 }
 0x4f5   :  { %9023 = vmatprep.subr.bf16.mxu1 %v10122_v12 }
 0x4fa   :  { %8496 = vmatmul.mubr.f32.vlgmr.msra.gmra.mrb[6].mxu0 %v4721_v9  ;;  %8531 = vmatmul.mubr.f32.vlgmr.msra.gmra.mrb[8].mxu1 %v5229_v59 }
 0x4fb   :  { %9025 = vmatpush3.bf16.msra.mxu1 %v10122_v12  ;;  %8537 = vmatprep.mubr.f32.mxu1 %v5219_v30 }
 0x502   :  { %8538 = vmatmul.mubr.f32.vlgmr.msra.gmra.mrb[8].mxu1 %v5229_v59 }
 0x56a   :  { %v8413_v58 = vpop.f32.mrb[4].mxu1 }
 0x56b   :  { %v4120_v56 = vpop.f32.mrb[5].mxu1 }
 0x59a   :  { %v8455_v60 = vpop.f32.mrb[6].mxu1 }
 0x59b   :  { %v4628_v61 = vpop.f32.mrb[7].mxu1 }
 0x5cd   :  { %v8497_v50 = vpop.f32.mrb[6].mxu0 }
 0x5ce   :  { %v5722_v1 = vcombine.low %v8413_v58, %v8497_v50  ;;  %v5723_v43 = vcombine.high %v8413_v58, %v8497_v50  ;;  %v5136_v47 = vpop.f32.mrb[7].mxu0 }
 0x5cf   :  { %v5654_v63 = vcombine.low %v4120_v56, %v5136_v47  ;;  %v5655_v54 = vcombine.high %v4120_v56, %v5136_v47 }
 0x5d0   :  { %v5730_v12 = vrot.slane %v5722_v1, %v9596_v3  ;;  %v5737_v45 = vrot.slane %v5723_v43, %v9596_v3 }
 0x5d1   :  { %v5662_v44 = vrot.slane %v5654_v63, %v9596_v3  ;;  %v5669_v46 = vrot.slane %v5655_v54, %v9596_v3 }
 0x5d5   :  { %v8539_v11 = vpop.f32.mrb[8].mxu1 }
 0x5d6   :  { %v5738_v42 = vcombine.low %v8455_v60, %v8539_v11  ;;  %v5739_v41 = vcombine.high %v8455_v60, %v8539_v11  ;;  %v5644_v4 = vpop.f32.mrb[9].mxu1 }
 0x5d7   :  { %v5670_v7 = vcombine.low %v4628_v61, %v5644_v4  ;;  %v5671_v22 = vcombine.high %v4628_v61, %v5644_v4 }
 0x5d8   :  { %v5746_v18 = vrot.slane %v5738_v42, %v9596_v3  ;;  %v5753_v32 = vrot.slane %v5739_v41, %v9596_v3 }
 0x5d9   :  { %v5678_v55 = vrot.slane %v5670_v7, %v9596_v3  ;;  %v5685_v19 = vrot.slane %v5671_v22, %v9596_v3 }
 0x5da   :  { %v5754_v13 = vcombine.low %v5730_v12, %v5746_v18  ;;  %v5755_v20 = vcombine.high %v5730_v12, %v5746_v18  ;;  %v5770_v17 = vcombine.low %v5737_v45, %v5753_v32  ;;  %v5771_v5 = vcombine.high %v5737_v45, %v5753_v32  ;;  %v5958_v45 = vld [vmem:[%s10478_s4 + $0x8] sm:$0xff]  ;;  %v5959_v18 = vld [vmem:[%s10478_s4 + $0x10] sm:$0xff] }
 0x5db   :  { %v5686_v6 = vcombine.low %v5662_v44, %v5678_v55  ;;  %v5687_v33 = vcombine.high %v5662_v44, %v5678_v55  ;;  %v5702_v38 = vcombine.low %v5669_v46, %v5685_v19  ;;  %v5703_v16 = vcombine.high %v5669_v46, %v5685_v19  ;;  %v5960_v46 = vld [vmem:[%s10478_s4 + $0x18] sm:$0xff] }
 0x5dc   :  { %v5762_v21 = vrot.slane %v5754_v13, %v9610_v10  ;;  %v5769_v24 = vrot.slane %v5755_v20, %v9610_v10  ;;  %v5778_v0 = vrot.slane %v5770_v17, %v9610_v10  ;;  %v5785_v29 = vrot.slane %v5771_v5, %v9610_v10 }
 0x5dd   :  { %v5694_v49 = vrot.slane %v5686_v6, %v9610_v10  ;;  %v5701_v53 = vrot.slane %v5687_v33, %v9610_v10  ;;  %v5710_v8 = vrot.slane %v5702_v38, %v9610_v10  ;;  %v5717_v57 = vrot.slane %v5703_v16, %v9610_v10 }
 0x5de   :  { %v5858_v52 = vcombine.low %v5762_v21, %v5769_v24  ;;  %v7771_v48 = vcombine.high %v5762_v21, %v5769_v24  ;;  %v5874_v9 = vcombine.low %v5778_v0, %v5785_v29  ;;  %v7772_v14 = vcombine.high %v5778_v0, %v5785_v29 }
 0x5df   :  { %v5790_v34 = vcombine.low %v5694_v49, %v5701_v53  ;;  %v7769_v15 = vcombine.high %v5694_v49, %v5701_v53  ;;  %v5806_v23 = vcombine.low %v5710_v8, %v5717_v57  ;;  %v7770_v28 = vcombine.high %v5710_v8, %v5717_v57 }
 0x5e0   :  { %v5865_v30 = vrot.slane %v5858_v52, %v9596_v3  ;;  %v5873_v31 = vrot.slane %v7771_v48, %v9596_v3  ;;  %v5881_v39 = vrot.slane %v5874_v9, %v9596_v3  ;;  %v5889_v51 = vrot.slane %v7772_v14, %v9596_v3 }
 0x5e1   :  { %v5797_v25 = vrot.slane %v5790_v34, %v9596_v3  ;;  %v5805_v26 = vrot.slane %v7769_v15, %v9596_v3  ;;  %v5813_v27 = vrot.slane %v5806_v23, %v9596_v3  ;;  %v5821_v59 = vrot.slane %v7770_v28, %v9596_v3 }
 0x5e2   :  { %v5891_v35 = vcombine.high %v5865_v30, %v5873_v31  ;;  %v5907_v36 = vcombine.high %v5881_v39, %v5889_v51  ;;  %v5890_v62 = vcombine.low %v5865_v30, %v5873_v31  ;;  %v5906_v2 = vcombine.low %v5881_v39, %v5889_v51 }
 0x5e3   :  { %v5823_v37 = vcombine.high %v5797_v25, %v5805_v26  ;;  %v5839_v40 = vcombine.high %v5813_v27, %v5821_v59  ;;  %v5822_v58 = vcombine.low %v5797_v25, %v5805_v26  ;;  %v5838_v56 = vcombine.low %v5813_v27, %v5821_v59 }
 0x5e4   :  { %v5905_v60 = vrot.slane %v5891_v35, %v9610_v10  ;;  %v5921_v61 = vrot.slane %v5907_v36, %v9610_v10  ;;  %v10241_v50 = vrot.slane %v5890_v62, %v9610_v10  ;;  %v10244_v1 = vrot.slane %v5906_v2, %v9610_v10 }
 0x5e5   :  { %v5837_v3 = vrot.slane %v5823_v37, %v9610_v10  ;;  %v5853_v43 = vrot.slane %v5839_v40, %v9610_v10  ;;  %v5830_v47 = vrot.slane %v5822_v58, %v9610_v10  ;;  %v5846_v63 = vrot.slane %v5838_v56, %v9610_v10  ;;  %v5957_v10 = vld [vmem:[%s10478_s4] sm:$0xff] }
 0x5e6   :  { %v5924_v54 = vcombine.low %v5905_v60, %v5921_v61  ;;  %v5923_v11 = vcombine.high %v10241_v50, %v10244_v1  ;;  %v5925_v42 = vcombine.high %v5905_v60, %v5921_v61  ;;  %v5922_v41 = vcombine.low %v10241_v50, %v10244_v1 }
 0x5e7   :  { %v5857_v4 = vcombine.high %v5837_v3, %v5853_v43  ;;  %v5855_v7 = vcombine.high %v5830_v47, %v5846_v63  ;;  %v5856_v22 = vcombine.low %v5837_v3, %v5853_v43  ;;  %v5854_v12 = vcombine.low %v5830_v47, %v5846_v63 }
 0x5e8   :  { %5938 = vrot.lane.b32.xlu1 %v5924_v54, %s9447_s1  ;;  %5930 = vrot.lane.b32.xlu0 %v5923_v11, %s9448_s24  ;;  %v5975_v32 = vand.u32 4294901760, %v5957_v10  ;;  %v5978_v44 = vand.u32 4294901760, %v5958_v45  ;;  %v5981_v55 = vand.u32 4294901760, %v5959_v18  ;;  %v5984_v19 = vand.u32 4294901760, %v5960_v46  ;;  %v7773_v54 = vld [vmem:[%s10479_s5] ss:$0 sm:$0xff] }
 0x5ea   :  { %v10268_v13 = vpack.c.bf16 %v5978_v44, %v5975_v32  ;;  %v10270_v20 = vpack.c.bf16 %v5984_v19, %v5981_v55  ;;  %v6065_v17 = vsub.f32 %v5957_v10, %v5975_v32  ;;  %v6072_v5 = vsub.f32 %v5958_v45, %v5978_v44 }
 0x5eb   :  { %v6079_v6 = vsub.f32 %v5959_v18, %v5981_v55  ;;  %v6086_v33 = vsub.f32 %v5960_v46, %v5984_v19 }
 0x5ec   :  { %5944 = vrot.lane.b32.xlu0 %v5857_v4, %s9449_s25  ;;  %5928 = vrot.lane.b32.xlu1 %v5855_v7, %s9448_s24  ;;  %v6066_v38 = vand.u32 4294901760, %v6065_v17  ;;  %v6073_v16 = vand.u32 4294901760, %v6072_v5  ;;  %v9042_v14 = vpack.c.bf16 %v6072_v5, %v6065_v17  ;;  %v9414_v7 = vld [vmem:[%s10474_s0 + $0x8] sm:$0xff] }
 0x5ed   :  { %9027 = vmatprep.subr.bf16.mxu0 %v10268_v13  ;;  %v6080_v21 = vand.u32 4294901760, %v6079_v6  ;;  %v6087_v24 = vand.u32 4294901760, %v6086_v33  ;;  %v9046_v15 = vpack.c.bf16 %v6086_v33, %v6079_v6 }
 0x5ee   :  { %9029 = vmatpush3.bf16.msra.mxu0 %v10268_v13  ;;  %v6067_v0 = vsub.f32 %v6065_v17, %v6066_v38  ;;  %v6074_v29 = vsub.f32 %v6072_v5, %v6073_v16  ;;  %v9058_v23 = vpack.c.bf16 %v6073_v16, %v6066_v38  ;;  %v6550_v38 = vld [vmem:[%s10480_s6 + $0x8] sm:$0xff]  ;;  %v6551_v16 = vld [vmem:[%s10480_s6 + $0x10] sm:$0xff] }
 0x5ef   :  { %9031 = vmatprep.subr.bf16.mxu0 %v10270_v20  ;;  %v6081_v49 = vsub.f32 %v6079_v6, %v6080_v21  ;;  %v6088_v53 = vsub.f32 %v6086_v33, %v6087_v24  ;;  %v9062_v28 = vpack.c.bf16 %v6087_v24, %v6080_v21  ;;  %v6549_v33 = vld [vmem:[%s10480_s6] sm:$0xff]  ;;  %v6570_v24 = vand.u32 4294901760, %v6550_v38 }
 0x5f0   :  { %5936 = vrot.lane.b32.xlu1 %v5856_v22, %s9447_s1  ;;  %v6068_v8 = vand.u32 4294901760, %v6067_v0  ;;  %v6075_v57 = vand.u32 4294901760, %v6074_v29  ;;  %v6567_v21 = vand.u32 4294901760, %v6549_v33  ;;  %v6552_v0 = vld [vmem:[%s10480_s6 + $0x18] sm:$0xff]  ;;  %v6573_v29 = vand.u32 4294901760, %v6551_v16 }
 0x5f1   :  { %v6082_v52 = vand.u32 4294901760, %v6081_v49  ;;  %v6089_v48 = vand.u32 4294901760, %v6088_v53  ;;  %v6576_v49 = vand.u32 4294901760, %v6552_v0 }
 0x5f2   :  { %9033 = vmatpush3.bf16.msra.mxu0 %v10270_v20  ;;  %v9034_v9 = vpack.c.bf16 %v6075_v57, %v6068_v8  ;;  %v10323_v53 = vpack.c.bf16 %v6570_v24, %v6567_v21  ;;  %v6657_v57 = vsub.f32 %v6549_v33, %v6567_v21  ;;  %v7137_v21 = vld [vmem:[%s10482_s8 + $0x18] sm:$0xff] }
 0x5f3   :  { %v9038_v34 = vpack.c.bf16 %v6089_v48, %v6082_v52  ;;  %v10325_v8 = vpack.c.bf16 %v6576_v49, %v6573_v29  ;;  %v6664_v52 = vsub.f32 %v6550_v38, %v6570_v24  ;;  %v6671_v48 = vsub.f32 %v6551_v16, %v6573_v29  ;;  %v7136_v16 = vld [vmem:[%s10482_s8 + $0x10] sm:$0xff]  ;;  %v7138_v24 = vld [vmem:[%s10482_s8 + $0x20] sm:$0xff] }
 0x5f4   :  { %5946 = vrot.lane.b32.xlu1 %v5925_v42, %s9449_s25  ;;  %9035 = vmatprep.subr.bf16.mxu0 %v9034_v9  ;;  %v7166_v29 = vand.u32 4294901760, %v7137_v21 }
 0x5f5   :  { %9075 = vmatprep.subr.bf16.mxu1 %v10323_v53 }
 0x5f6   :  { %9077 = vmatpush3.bf16.msra.mxu1 %v10323_v53 }
 0x5f7   :  { %9079 = vmatprep.subr.bf16.mxu1 %v10325_v8 }
 0x5fa   :  { %9081 = vmatpush3.bf16.msra.mxu1 %v10325_v8 }
 0x65a   :  { %v5939_v30 = vpop.permute.xlu1 %5938  ;;  %v5931_v31 = vpop.permute.xlu0 %5930 }
 0x65b   :  { %v5951_v26 = vsel %vm1476_vm1, %v5922_v41, %v5931_v31 }
 0x65c   :  { %v5953_v2 = vsel %vm3533_vm2, %v5951_v26, %v5939_v30 }
 0x65e   :  { %v5929_v39 = vpop.permute.xlu1 %5928  ;;  %v5945_v27 = vpop.permute.xlu0 %5944 }
 0x65f   :  { %v5950_v51 = vsel %vm1476_vm1, %v5854_v12, %v5929_v39  ;;  %v9415_v12 = vld [vmem:[%s10474_s0] sm:$0xff] }
 0x662   :  { %v5937_v25 = vpop.permute.xlu1 %5936 }
 0x663   :  { %v5952_v59 = vsel %vm3533_vm2, %v5950_v51, %v5937_v25 }
 0x664   :  { %v5955_v35 = vsel %vm5954_vm3, %v5952_v59, %v5945_v27 }
 0x665   :  { %v5969_v36 = vsel %vm57_vm0, %v5955_v35, 0  ;;  %v9090_v35 = vpack.c.bf16 %v6664_v52, %v6657_v57 }
 0x666   :  { %v6043_v62 = vand.u32 4294901760, %v5969_v36  ;;  %v5947_v37 = vpop.permute.xlu1 %5946 }
 0x667   :  { %v5956_v40 = vsel %vm5954_vm3, %v5953_v2, %v5947_v37 }
 0x668   :  { %v6044_v58 = vsub.f32 %v5969_v36, %v6043_v62  ;;  %v5972_v56 = vsel %vm57_vm0, %v5956_v40, 0 }
 0x669   :  { %v6053_v60 = vand.u32 4294901760, %v5972_v56 }
 0x66a   :  { %v6045_v61 = vand.u32 4294901760, %v6044_v58 }
 0x66b   :  { %v6054_v50 = vsub.f32 %v5972_v56, %v6053_v60 }
 0x66c   :  { %v6046_v1 = vsub.f32 %v6044_v58, %v6045_v61 }
 0x66d   :  { %v6055_v3 = vand.u32 4294901760, %v6054_v50 }
 0x66e   :  { %v6047_v43 = vand.u32 4294901760, %v6046_v1 }
 0x66f   :  { %v6056_v47 = vsub.f32 %v6054_v50, %v6055_v3 }
 0x670   :  { %8548 = vmatprep.mubr.f32.mxu0 %v6047_v43 }
 0x671   :  { %v6057_v63 = vand.u32 4294901760, %v6056_v47  ;;  %v7775_v47 = vld [vmem:[%s10485_s11] ss:$0 sm:$0xff] }
 0x673   :  { %8549 = vmatmul.mubr.f32.vlgmr.msra.gmra.mrb[8].mxu0 %v6057_v63 }
 0x674   :  { %9037 = vmatpush3.bf16.msra.mxu0 %v9034_v9  ;;  %8559 = vmatprep.mubr.f32.mxu0 %v6043_v62  ;;  %v6678_v9 = vsub.f32 %v6552_v0, %v6576_v49  ;;  %v7163_v0 = vand.u32 4294901760, %v7136_v16  ;;  %v7139_v49 = vld [vmem:[%s10482_s8 + $0x28] sm:$0xff] }
 0x675   :  { %9039 = vmatprep.subr.bf16.mxu0 %v9038_v34 }
 0x678   :  { %9041 = vmatpush3.bf16.msra.mxu0 %v9038_v34  ;;  %v6665_v34 = vand.u32 4294901760, %v6664_v52 }
 0x679   :  { %9043 = vmatprep.subr.bf16.mxu0 %v9042_v14 }
 0x67a   :  { %v6666_v30 = vsub.f32 %v6664_v52, %v6665_v34  ;;  %v10367_v52 = vpack.c.bf16 %v7166_v29, %v7163_v0 }
 0x67b   :  { %8560 = vmatmul.mubr.f32.vlgmr.msra.gmra.mrb[8].mxu0 %v6053_v60 }
 0x67c   :  { %9045 = vmatpush3.bf16.msra.mxu0 %v9042_v14  ;;  %8570 = vmatprep.mubr.f32.mxu0 %v6044_v58  ;;  %v6658_v14 = vand.u32 4294901760, %v6657_v57  ;;  %v6667_v25 = vand.u32 4294901760, %v6666_v30 }
 0x67d   :  { %9047 = vmatprep.subr.bf16.mxu0 %v9046_v15 }
 0x67e   :  { %v9106_v2 = vpack.c.bf16 %v6665_v34, %v6658_v14 }
 0x680   :  { %9049 = vmatpush3.bf16.msra.mxu0 %v9046_v15  ;;  %v6672_v15 = vand.u32 4294901760, %v6671_v48 }
 0x681   :  { %9051 = vmatprep.subr.bf16.mxu0 %v10268_v13 }
 0x682   :  { %v6673_v31 = vsub.f32 %v6671_v48, %v6672_v15 }
 0x683   :  { %8571 = vmatmul.mubr.f32.vlgmr.msra.gmra.mrb[8].mxu0 %v6054_v50 }
 0x684   :  { %9053 = vmatpush3.bf16.msra.mxu0 %v10268_v13  ;;  %8581 = vmatprep.mubr.f32.mxu0 %v6045_v61  ;;  %v6674_v26 = vand.u32 4294901760, %v6673_v31 }
 0x685   :  { %9055 = vmatprep.subr.bf16.mxu0 %v10270_v20 }
 0x688   :  { %9057 = vmatpush3.bf16.msra.mxu0 %v10270_v20 }
 0x689   :  { %9059 = vmatprep.subr.bf16.mxu0 %v9058_v23 }
 0x68b   :  { %8582 = vmatmul.mubr.f32.vlgmr.msra.gmra.mrb[8].mxu0 %v6055_v3  ;;  %v7774_v3 = vld [vmem:[%s10484_s10] ss:$0 sm:$0xff] }
 0x68c   :  { %9061 = vmatpush3.bf16.msra.mxu0 %v9058_v23  ;;  %8592 = vmatprep.mubr.f32.mxu0 %v6043_v62  ;;  %v6679_v23 = vand.u32 4294901760, %v6678_v9 }
 0x68d   :  { %9063 = vmatprep.subr.bf16.mxu0 %v9062_v28 }
 0x68e   :  { %v6680_v39 = vsub.f32 %v6678_v9, %v6679_v23  ;;  %v9110_v37 = vpack.c.bf16 %v6679_v23, %v6672_v15 }
 0x690   :  { %9065 = vmatpush3.bf16.msra.mxu0 %v9062_v28  ;;  %v6659_v28 = vsub.f32 %v6657_v57, %v6658_v14  ;;  %v6681_v27 = vand.u32 4294901760, %v6680_v39  ;;  %v7172_v57 = vand.u32 4294901760, %v7139_v49 }
 0x691   :  { %9067 = vmatprep.subr.bf16.mxu0 %v10268_v13 }
 0x692   :  { %v6660_v51 = vand.u32 4294901760, %v6659_v28  ;;  %v9086_v36 = vpack.c.bf16 %v6681_v27, %v6674_v26  ;;  %v7265_v27 = vsub.f32 %v7136_v16, %v7163_v0 }
 0x693   :  { %8593 = vmatmul.mubr.f32.vlgmr.msra.gmra.mrb[8].mxu0 %v6053_v60 }
 0x694   :  { %9069 = vmatpush3.bf16.msra.mxu0 %v10268_v13  ;;  %8603 = vmatprep.mubr.f32.mxu0 %v6043_v62  ;;  %v9082_v59 = vpack.c.bf16 %v6667_v25, %v6660_v51  ;;  %v9094_v62 = vpack.c.bf16 %v6678_v9, %v6671_v48  ;;  %v7140_v48 = vld [vmem:[%s10482_s8 + $0x30] sm:$0xff]  ;;  %v7141_v9 = vld [vmem:[%s10482_s8 + $0x38] sm:$0xff] }
 0x695   :  { %9071 = vmatprep.subr.bf16.mxu0 %v10270_v20  ;;  %v7175_v34 = vand.u32 4294901760, %v7140_v48  ;;  %v7178_v15 = vand.u32 4294901760, %v7141_v9 }
 0x696   :  { %9083 = vmatprep.subr.bf16.mxu1 %v9082_v59 }
 0x697   :  { %v10387_v23 = vpack.c.bf16 %v7178_v15, %v7175_v34 }
 0x698   :  { %9073 = vmatpush3.bf16.msra.mxu0 %v10270_v20 }
 0x69b   :  { %8604 = vmatmul.mubr.f32.vlgmr.msra.gmra.mrb[8].mxu0 %v6053_v60 }
 0x76e   :  { %v8605_v11 = vpop.f32.mrb[8].mxu0 }
 0x76f   :  { %v9228_v42 = vadd.f32 %v8605_v11, %v7773_v54  ;;  %v6492_v41 = vpop.f32.mrb[9].mxu0 }
 0x770   :  { %v9229_v4 = vadd.f32 %v7773_v54, %v6492_v41 }
 0x771   :  { %v10296_v22 = vadd.f32 %v9414_v7, %v9228_v42 }
 0x772   :  { %v10301_v10 = vadd.f32 %v9415_v12, %v9229_v4 }
 0x773   :  { %v6507_v45 = vsel %vm57_vm0, %v10296_v22, 0.0 }
 0x774   :  { %6508 = vadd.xlane.f32.xlu1 %v6507_v45  ;;  %v6504_v18 = vsel %vm57_vm0, %v10301_v10, 0.0 }
 0x775   :  { %6505 = vadd.xlane.f32.xlu0 %v6504_v18 }
 0x801   :  { %v6509_v32 = vpop.xlane.xlu1 %6508 }
 0x802   :  { %v6512_v44 = vmul.f32 0.03125, %v6509_v32  ;;  %v6506_v46 = vpop.xlane.xlu0 %6505 }
 0x803   :  { %v6511_v55 = vmul.f32 0.03125, %v6506_v46 }
 0x804   :  { %v6514_v19 = vsub.f32 %v10296_v22, %v6512_v44 }
 0x805   :  { %v6513_v13 = vsub.f32 %v10301_v10, %v6511_v55 }
 0x806   :  { %v6516_v5 = vmul.f32 %v6514_v19, %v6514_v19 }
 0x807   :  { %v6515_v20 = vmul.f32 %v6513_v13, %v6513_v13 }
 0x808   :  { %v6520_v6 = vsel %vm57_vm0, %v6516_v5, 0.0 }
 0x809   :  { %v6517_v17 = vsel %vm57_vm0, %v6515_v20, 0.0 }
 0x80a   :  { %6518 = vadd.xlane.f32.xlu0 %v6517_v17 }
 0x80e   :  { %6521 = vadd.xlane.f32.xlu0 %v6520_v6  ;;  %v7135_v6 = vld [vmem:[%s10482_s8 + $0x8] sm:$0xff] }
 0x80f   :  { %v7160_v38 = vand.u32 4294901760, %v7135_v6 }
 0x811   :  { %v7258_v30 = vsub.f32 %v7135_v6, %v7160_v38 }
 0x813   :  { %v7259_v39 = vand.u32 4294901760, %v7258_v30 }
 0x815   :  { %v7260_v26 = vsub.f32 %v7258_v30, %v7259_v39 }
 0x897   :  { %v6519_v40 = vpop.xlane.xlu0 %6518 }
 0x898   :  { %v6523_v58 = vmul.f32 0.03125, %v6519_v40  ;;  %v7286_v40 = vsub.f32 %v7139_v49, %v7172_v57 }
 0x89a   :  { %v6525_v56 = vadd.f32 1e-05, %v6523_v58 }
 0x89b   :  { %v6522_v60 = vpop.xlane.xlu0 %6521 }
 0x89c   :  { %9398 = vrsqrt.f32 %v6525_v56  ;;  %v6524_v61 = vmul.f32 0.03125, %v6522_v60 }
 0x89e   :  { %v6526_v50 = vadd.f32 1e-05, %v6524_v61 }
 0x8a0   :  { %9400 = vrsqrt.f32 %v6526_v50 }
 0x8a6   :  { %v9399_v1 = vpop.eup %9398 }
 0x8a7   :  { %v6529_v43 = vmul.f32 %v9399_v1, %v6513_v13  ;;  %v7287_v1 = vand.u32 4294901760, %v7286_v40 }
 0x8a9   :  { %v6538_v63 = vmul.f32 %v7774_v3, %v6529_v43 }
 0x8aa   :  { %v9401_v54 = vpop.eup %9400 }
 0x8ab   :  { %v6530_v11 = vmul.f32 %v9401_v54, %v6514_v19  ;;  %v6547_v42 = vadd.f32 %v7775_v47, %v6538_v63  ;;  %v7134_v19 = vld [vmem:[%s10482_s8] sm:$0xff]  ;;  %v7293_v63 = vsub.f32 %v7140_v48, %v7175_v34 }
 0x8ac   :  { %v7157_v33 = vand.u32 4294901760, %v7134_v19 }
 0x8ad   :  { %v6539_v41 = vmul.f32 %v7774_v3, %v6530_v11  ;;  %v6561_v4 = vsel %vm57_vm0, %v6547_v42, 0  ;;  %v7288_v11 = vsub.f32 %v7286_v40, %v7287_v1  ;;  %v7300_v42 = vsub.f32 %v7141_v9, %v7178_v15 }
 0x8ae   :  { %v6635_v7 = vand.u32 4294901760, %v6561_v4  ;;  %v7251_v28 = vsub.f32 %v7134_v19, %v7157_v33 }
 0x8af   :  { %v6548_v12 = vadd.f32 %v7775_v47, %v6539_v41  ;;  %v10419_v6 = vpack.c.bf16 %v7300_v42, %v7293_v63 }
 0x8b0   :  { %v6636_v45 = vsub.f32 %v6561_v4, %v6635_v7  ;;  %v7252_v31 = vand.u32 4294901760, %v7251_v28 }
 0x8b1   :  { %v6564_v18 = vsel %vm57_vm0, %v6548_v12, 0  ;;  %v7289_v12 = vand.u32 4294901760, %v7288_v11 }
 0x8b2   :  { %v6637_v32 = vand.u32 4294901760, %v6636_v45  ;;  %v6645_v44 = vand.u32 4294901760, %v6564_v18  ;;  %v10393_v51 = vpack.c.bf16 %v7259_v39, %v7252_v31  ;;  %v7253_v25 = vsub.f32 %v7251_v28, %v7252_v31 }
 0x8b4   :  { %v6638_v46 = vsub.f32 %v6636_v45, %v6637_v32  ;;  %v6646_v55 = vsub.f32 %v6564_v18, %v6645_v44 }
 0x8b6   :  { %v6639_v13 = vand.u32 4294901760, %v6638_v46  ;;  %v6647_v20 = vand.u32 4294901760, %v6646_v55 }
 0x8b8   :  { %8614 = vmatprep.mubr.f32.mxu1 %v6639_v13  ;;  %v6648_v17 = vsub.f32 %v6646_v55, %v6647_v20 }
 0x8ba   :  { %v6649_v5 = vand.u32 4294901760, %v6648_v17  ;;  %v10413_v17 = vpack.c.bf16 %v7258_v30, %v7251_v28 }
 0x8bc   :  { %8615 = vmatmul.mubr.f32.vlgmr.msra.gmra.mrb[10].mxu1 %v6649_v5 }
 0x8bd   :  { %9085 = vmatpush3.bf16.msra.mxu1 %v9082_v59  ;;  %8625 = vmatprep.mubr.f32.mxu1 %v6635_v7  ;;  %v7272_v59 = vsub.f32 %v7137_v21, %v7166_v29 }
 0x8be   :  { %9087 = vmatprep.subr.bf16.mxu1 %v9086_v36 }
 0x8bf   :  { %v10415_v5 = vpack.c.bf16 %v7272_v59, %v7265_v27 }
 0x8c1   :  { %9089 = vmatpush3.bf16.msra.mxu1 %v9086_v36  ;;  %v7261_v36 = vand.u32 4294901760, %v7260_v26 }
 0x8c2   :  { %9091 = vmatprep.subr.bf16.mxu1 %v9090_v35 }
 0x8c4   :  { %8626 = vmatmul.mubr.f32.vlgmr.msra.gmra.mrb[10].mxu1 %v6645_v44 }
 0x8c5   :  { %9093 = vmatpush3.bf16.msra.mxu1 %v9090_v35  ;;  %8636 = vmatprep.mubr.f32.mxu1 %v6636_v45  ;;  %v7254_v35 = vand.u32 4294901760, %v7253_v25  ;;  %v7301_v45 = vand.u32 4294901760, %v7300_v42 }
 0x8c6   :  { %9095 = vmatprep.subr.bf16.mxu1 %v9094_v62 }
 0x8c7   :  { %v10398_v58 = vpack.c.bf16 %v7261_v36, %v7254_v35  ;;  %v7302_v46 = vsub.f32 %v7300_v42, %v7301_v45 }
 0x8c9   :  { %9097 = vmatpush3.bf16.msra.mxu1 %v9094_v62  ;;  %v7266_v62 = vand.u32 4294901760, %v7265_v27  ;;  %v7303_v13 = vand.u32 4294901760, %v7302_v46 }
 0x8ca   :  { %9099 = vmatprep.subr.bf16.mxu1 %v10323_v53 }
 0x8cb   :  { %v7267_v60 = vsub.f32 %v7265_v27, %v7266_v62 }
 0x8cc   :  { %8637 = vmatmul.mubr.f32.vlgmr.msra.gmra.mrb[10].mxu1 %v6646_v55 }
 0x8cd   :  { %9101 = vmatpush3.bf16.msra.mxu1 %v10323_v53  ;;  %8647 = vmatprep.mubr.f32.mxu1 %v6637_v32  ;;  %v7268_v3 = vand.u32 4294901760, %v7267_v60 }
 0x8ce   :  { %9103 = vmatprep.subr.bf16.mxu1 %v10325_v8 }
 0x8d1   :  { %9105 = vmatpush3.bf16.msra.mxu1 %v10325_v8 }
 0x8d2   :  { %9107 = vmatprep.subr.bf16.mxu1 %v9106_v2 }
 0x8d4   :  { %8648 = vmatmul.mubr.f32.vlgmr.msra.gmra.mrb[10].mxu1 %v6647_v20 }
 0x8d5   :  { %9109 = vmatpush3.bf16.msra.mxu1 %v9106_v2  ;;  %8658 = vmatprep.mubr.f32.mxu1 %v6635_v7  ;;  %v7273_v2 = vand.u32 4294901760, %v7272_v59 }
 0x8d6   :  { %9111 = vmatprep.subr.bf16.mxu1 %v9110_v37 }
 0x8d7   :  { %v10400_v56 = vpack.c.bf16 %v7273_v2, %v7266_v62  ;;  %v7274_v61 = vsub.f32 %v7272_v59, %v7273_v2 }
 0x8d9   :  { %9113 = vmatpush3.bf16.msra.mxu1 %v9110_v37  ;;  %v7275_v43 = vand.u32 4294901760, %v7274_v61 }
 0x8da   :  { %9115 = vmatprep.subr.bf16.mxu1 %v10323_v53 }
 0x8db   :  { %v10405_v41 = vpack.c.bf16 %v7275_v43, %v7268_v3 }
 0x8dc   :  { %8659 = vmatmul.mubr.f32.vlgmr.msra.gmra.mrb[10].mxu1 %v6645_v44 }
 0x8dd   :  { %9117 = vmatpush3.bf16.msra.mxu1 %v10323_v53  ;;  %8669 = vmatprep.mubr.f32.mxu1 %v6635_v7  ;;  %v10365_v53 = vpack.c.bf16 %v7160_v38, %v7157_v33  ;;  %v7294_v7 = vand.u32 4294901760, %v7293_v63  ;;  %v7776_v33 = vld [vmem:[%s10481_s7] ss:$0 sm:$0xff] }
 0x8de   :  { %9119 = vmatprep.subr.bf16.mxu1 %v10325_v8 }
 0x8df   :  { %9171 = vmatprep.subr.bf16.mxu0 %v10365_v53  ;;  %v7295_v18 = vsub.f32 %v7293_v63, %v7294_v7 }
 0x8e0   :  { %9173 = vmatpush3.bf16.msra.mxu0 %v10365_v53 }
 0x8e1   :  { %9121 = vmatpush3.bf16.msra.mxu1 %v10325_v8  ;;  %v7169_v8 = vand.u32 4294901760, %v7138_v24  ;;  %9175 = vmatprep.subr.bf16.mxu0 %v10367_v52  ;;  %v7296_v55 = vand.u32 4294901760, %v7295_v18 }
 0x8e2   :  { %9123 = vmatprep.subr.bf16.mxu1 %v10365_v53 }
 0x8e3   :  { %v10381_v14 = vpack.c.bf16 %v7172_v57, %v7169_v8  ;;  %v7279_v37 = vsub.f32 %v7138_v24, %v7169_v8  ;;  %v10411_v20 = vpack.c.bf16 %v7303_v13, %v7296_v55 }
 0x8e4   :  { %8670 = vmatmul.mubr.f32.vlgmr.msra.gmra.mrb[10].mxu1 %v6645_v44  ;;  %9177 = vmatpush3.bf16.msra.mxu0 %v10367_v52  ;;  %v10409_v44 = vpack.c.bf16 %v7301_v45, %v7294_v7 }
 0x8e5   :  { %9125 = vmatpush3.bf16.msra.mxu1 %v10365_v53  ;;  %9179 = vmatprep.subr.bf16.mxu0 %v10381_v14  ;;  %v7280_v50 = vand.u32 4294901760, %v7279_v37  ;;  %v10417_v19 = vpack.c.bf16 %v7286_v40, %v7279_v37 }
 0x8e6   :  { %9127 = vmatprep.subr.bf16.mxu1 %v10367_v52 }
 0x8e7   :  { %v7281_v47 = vsub.f32 %v7279_v37, %v7280_v50  ;;  %v10403_v54 = vpack.c.bf16 %v7287_v1, %v7280_v50 }
 0x8e8   :  { %9181 = vmatpush3.bf16.msra.mxu0 %v10381_v14 }
 0x8e9   :  { %9129 = vmatpush3.bf16.msra.mxu1 %v10367_v52  ;;  %9183 = vmatprep.subr.bf16.mxu0 %v10387_v23  ;;  %v7282_v4 = vand.u32 4294901760, %v7281_v47 }
 0x8ea   :  { %9131 = vmatprep.subr.bf16.mxu1 %v10381_v14 }
 0x8eb   :  { %v10407_v32 = vpack.c.bf16 %v7289_v12, %v7282_v4 }
 0x8ec   :  { %9185 = vmatpush3.bf16.msra.mxu0 %v10387_v23 }
 0x8ed   :  { %9133 = vmatpush3.bf16.msra.mxu1 %v10381_v14  ;;  %9187 = vmatprep.subr.bf16.mxu0 %v10393_v51 }
 0x8ee   :  { %9135 = vmatprep.subr.bf16.mxu1 %v10387_v23 }
 0x8f1   :  { %9137 = vmatpush3.bf16.msra.mxu1 %v10387_v23 }
 0x8f2   :  { %9139 = vmatprep.subr.bf16.mxu1 %v10398_v58 }
 0x9b7   :  { %v8671_v38 = vpop.f32.mrb[10].mxu1 }
 0x9b8   :  { %v9230_v16 = vadd.f32 %v8671_v38, %v7776_v33  ;;  %v7084_v21 = vpop.f32.mrb[11].mxu1 }
 0x9b9   :  { %v9231_v24 = vadd.f32 %v7776_v33, %v7084_v21 }
 0x9ba   :  { %v7101_v0 = vand.u32 2147483647, %v9230_v16  ;;  %v7095_v2 = vmax.f32 %v9230_v16, 0.0  ;;  %vm7097_vm6 = vcmp.ne.f32.partialorder %v9230_v16, %v9230_v16 }
 0x9bb   :  { %v7100_v29 = vand.u32 2147483647, %v9231_v24  ;;  %v7094_v61 = vmax.f32 %v9231_v24, 0.0  ;;  %vm7096_vm7 = vcmp.ne.f32.partialorder %v9231_v24, %v9231_v24 }
 0x9bc   :  { %v7103_v49 = vsub.f32 0.0, %v7101_v0 }
 0x9bd   :  { %v7102_v8 = vsub.f32 0.0, %v7100_v29 }
 0x9be   :  { %v7106_v57 = vmul.f32 1.442695, %v7103_v49 }
 0x9bf   :  { %v7104_v48 = vmul.f32 1.442695, %v7102_v8 }
 0x9c0   :  { %9402 = vpow2.f32 %v7106_v57 }
 0x9c1   :  { %9404 = vpow2.f32 %v7104_v48 }
 0x9ca   :  { %v9403_v9 = vpop.eup %9402 }
 0x9cb   :  { %v9405_v34 = vpop.eup %9404  ;;  %v7117_v15 = vadd.f32 1.0, %v9403_v9  ;;  %v7120_v30 = vmul.f32 -0.5, %v9403_v9  ;;  %v7123_v25 = vand.u32 2147483647, %v9403_v9 }
 0x9cc   :  { %v7108_v28 = vadd.f32 1.0, %v9405_v34  ;;  %v7111_v31 = vmul.f32 -0.5, %v9405_v34  ;;  %v7114_v27 = vand.u32 2147483647, %v9405_v34 }
 0x9cd   :  { %9406 = vlog2.f32 %v7117_v15  ;;  %v7121_v39 = vadd.f32 1.0, %v7120_v30  ;;  %vm7124_vm4 = vcmp.lt.f32.partialorder %v7123_v25, 0.0004427343 }
 0x9ce   :  { %9408 = vlog2.f32 %v7108_v28  ;;  %v7112_v26 = vadd.f32 1.0, %v7111_v31  ;;  %vm7115_vm5 = vcmp.lt.f32.partialorder %v7114_v27, 0.0004427343 }
 0x9cf   :  { %v7122_v62 = vmul.f32 %v9403_v9, %v7121_v39 }
 0x9d0   :  { %v7113_v40 = vmul.f32 %v9405_v34, %v7112_v26 }
 0x9d7   :  { %v9407_v59 = vpop.eup %9406 }
 0x9d8   :  { %v9409_v35 = vpop.eup %9408  ;;  %v7119_v36 = vmul.f32 0.6931472, %v9407_v59 }
 0x9d9   :  { %v7110_v37 = vmul.f32 0.6931472, %v9409_v35 }
 0x9da   :  { %v7125_v60 = vsel %vm7124_vm4, %v7122_v62, %v7119_v36 }
 0x9db   :  { %v7127_v50 = vadd.f32 %v7125_v60, %v7095_v2  ;;  %v7116_v1 = vsel %vm7115_vm5, %v7113_v40, %v7110_v37 }
 0x9dc   :  { %v7126_v3 = vadd.f32 %v7116_v1, %v7094_v61 }
 0x9dd   :  { %v7129_v43 = vsel %vm7097_vm6, %v9230_v16, %v7127_v50 }
 0x9de   :  { %9410 = vtanh.f32 %v7129_v43  ;;  %v7128_v47 = vsel %vm7096_vm7, %v9231_v24, %v7126_v3 }
 0x9df   :  { %9412 = vtanh.f32 %v7128_v47 }
 0x9e8   :  { %v9411_v63 = vpop.eup %9410 }
 0x9e9   :  { %v9413_v11 = vpop.eup %9412  ;;  %v7133_v42 = vmul.f32 %v9411_v63, %v9230_v16 }
 0x9ea   :  { %v7132_v4 = vmul.f32 %v9413_v11, %v9231_v24 }
 0x9eb   :  { %v7154_v7 = vsel %vm7149_vm8, %v7133_v42, 0 }
 0x9ec   :  { %v7151_v12 = vsel %vm7149_vm8, %v7132_v4, 0  ;;  %v7239_v45 = vand.u32 4294901760, %v7154_v7 }
 0x9ed   :  { %v7229_v18 = vand.u32 4294901760, %v7151_v12 }
 0x9ee   :  { %v7240_v46 = vsub.f32 %v7154_v7, %v7239_v45 }
 0x9ef   :  { %v7230_v55 = vsub.f32 %v7151_v12, %v7229_v18 }
 0x9f0   :  { %v7241_v13 = vand.u32 4294901760, %v7240_v46 }
 0x9f1   :  { %v7231_v33 = vand.u32 4294901760, %v7230_v55 }
 0x9f2   :  { %v7242_v38 = vsub.f32 %v7240_v46, %v7241_v13 }
 0x9f3   :  { %8745 = vmatprep.mubr.f32.mxu0 %v7231_v33  ;;  %v7232_v21 = vsub.f32 %v7230_v55, %v7231_v33 }
 0x9f4   :  { %8746 = vmatmul.mubr.f32.vlgmr.msra.gmra.mrb[10].mxu0 %v7241_v13  ;;  %v7243_v16 = vand.u32 4294901760, %v7242_v38 }
 0x9f5   :  { %9189 = vmatpush3.bf16.msra.mxu0 %v10393_v51  ;;  %8764 = vmatprep.mubr.f32.mxu0 %v7229_v18  ;;  %v7233_v0 = vand.u32 4294901760, %v7232_v21 }
 0x9f6   :  { %9191 = vmatprep.subr.bf16.mxu0 %v10400_v56 }
 0x9f7   :  { %8688 = vmatprep.mubr.f32.mxu1 %v7233_v0 }
 0x9f8   :  { %8689 = vmatmul.mubr.f32.vlgmr.msra.gmra.mrb[12].mxu1 %v7243_v16 }
 0x9f9   :  { %9141 = vmatpush3.bf16.msra.mxu1 %v10398_v58  ;;  %9193 = vmatpush3.bf16.msra.mxu0 %v10400_v56 }
 0x9fa   :  { %8707 = vmatprep.mubr.f32.mxu1 %v7229_v18  ;;  %9143 = vmatprep.subr.bf16.mxu1 %v10405_v41 }
 0x9fb   :  { %9195 = vmatprep.subr.bf16.mxu0 %v10403_v54 }
 0x9fd   :  { %9145 = vmatpush3.bf16.msra.mxu1 %v10405_v41  ;;  %9197 = vmatpush3.bf16.msra.mxu0 %v10403_v54 }
 0x9fe   :  { %9147 = vmatprep.subr.bf16.mxu1 %v10407_v32  ;;  %9199 = vmatprep.subr.bf16.mxu0 %v10409_v44 }
 0xa01   :  { %9149 = vmatpush3.bf16.msra.mxu1 %v10407_v32  ;;  %9201 = vmatpush3.bf16.msra.mxu0 %v10409_v44 }
 0xa02   :  { %9151 = vmatprep.subr.bf16.mxu1 %v10411_v20  ;;  %9203 = vmatprep.subr.bf16.mxu0 %v10365_v53 }
 0xa04   :  { %8765 = vmatmul.mubr.f32.vlgmr.msra.gmra.mrb[10].mxu0 %v7239_v45 }
 0xa05   :  { %9153 = vmatpush3.bf16.msra.mxu1 %v10411_v20  ;;  %9205 = vmatpush3.bf16.msra.mxu0 %v10365_v53 }
 0xa06   :  { %8783 = vmatprep.mubr.f32.mxu0 %v7229_v18  ;;  %9155 = vmatprep.subr.bf16.mxu1 %v10413_v17 }
 0xa07   :  { %9207 = vmatprep.subr.bf16.mxu0 %v10367_v52 }
 0xa08   :  { %8708 = vmatmul.mubr.f32.vlgmr.msra.gmra.mrb[12].mxu1 %v7239_v45 }
 0xa09   :  { %9157 = vmatpush3.bf16.msra.mxu1 %v10413_v17  ;;  %8726 = vmatprep.mubr.f32.mxu1 %v7230_v55 }
 0xa0a   :  { %9209 = vmatpush3.bf16.msra.mxu0 %v10367_v52  ;;  %9159 = vmatprep.subr.bf16.mxu1 %v10415_v5 }
 0xa0b   :  { %9211 = vmatprep.subr.bf16.mxu0 %v10381_v14 }
 0xa0d   :  { %9161 = vmatpush3.bf16.msra.mxu1 %v10415_v5 }
 0xa0e   :  { %9213 = vmatpush3.bf16.msra.mxu0 %v10381_v14  ;;  %9163 = vmatprep.subr.bf16.mxu1 %v10417_v19  ;;  %v7777_v14 = vld [vmem:[%s10483_s9] ss:$0 sm:$0xff] }
 0xa0f   :  { %9215 = vmatprep.subr.bf16.mxu0 %v10387_v23 }
 0xa11   :  { %9165 = vmatpush3.bf16.msra.mxu1 %v10417_v19 }
 0xa12   :  { %9217 = vmatpush3.bf16.msra.mxu0 %v10387_v23  ;;  %9167 = vmatprep.subr.bf16.mxu1 %v10419_v6 }
 0xa15   :  { %8784 = vmatmul.mubr.f32.vlgmr.msra.gmra.mrb[10].mxu0 %v7239_v45  ;;  %9169 = vmatpush3.bf16.msra.mxu1 %v10419_v6 }
 0xa18   :  { %8727 = vmatmul.mubr.f32.vlgmr.msra.gmra.mrb[12].mxu1 %v7240_v46 }
 0xae8   :  { %v8785_v53 = vpop.f32.mrb[10].mxu0 }
 0xae9   :  { %v7726_v52 = vpop.f32.mrb[11].mxu0 }
 0xaeb   :  { %v8728_v51 = vpop.f32.mrb[12].mxu1 }
 0xaec   :  { %v9232_v58 = vadd.f32 %v8728_v51, %v7777_v14  ;;  %v7450_v56 = vpop.f32.mrb[13].mxu1 }
 0xaed   :  { %v9234_v54 = vadd.f32 %v7777_v14, %v7450_v56 }
 0xaee   :  { %v9233_v41 = vadd.f32 %v9232_v58, %v8785_v53 }
 0xaef   :  { %v9235_v23 = vadd.f32 %v9234_v54, %v7726_v52 }
 0xaf0   :  { %v7737_v32 = vadd.f32 %v9233_v41, %v10296_v22 }
 0xaf1   :  { %v7736_v44 = vadd.f32 %v9235_v23, %v10301_v10 }
 0xaf2   :  { %7739 = vst.msk [vmem:[#allocation2 + $0x8] sm:$0xff] %vm57_vm0, %v7737_v32 }
 0xaf3   :  { %7738 = vst.msk [vmem:[#allocation2] sm:$0xff] %vm57_vm0, %v7736_v44 }
 0xaf4   :  { %9427 = shalt.err (!%p9424_p4)
}
 0xaf5   :  { %s9428_s6 = scalar_lea.hbm %s10486_s12, 256 }
 0xaf6   :  { %p9429_p5 = scmp.ne.s32.totalorder %s10486_s12, %s9428_s6  ;;  %p9432_p6 = scmp.lt.u32.totalorder %s9428_s6, %s10486_s12 }
 0xaf8   :  { %p9434_p7 = pnand %p9432_p6, %p9429_p5 }
 0xafa   :  { %9437 = shalt.err (!%p9434_p7)
}
 0xafb   :  { %s9451_s11 = smov 128  }
 0xafc   :  { %7751 = dma.vmem_to_hbm [thread:$0]  %s7746_s22, 256, %s10486_s12, [#allocation3], %s9451_s11, %s9451_s11, %s9448_s24  }
 0xafd   :  { %9438 = dma.done.wait [#allocation3], 256  }
 0xafe   :  { %9439 = vsyncadd [#allocation3], 4294967040 }
 0xaff   :  { %7755 = vsyncpa [#allocation3], 1 }

</bundles_post_ra>
